<compile_context>
chip_gen: v5e
topology: v5e:2x2
jax: 0.10.0
libtpu: 0.0.40
codegen_flags: <defaults>
</compile_context>

<pallas_src>
import jax
import jax.numpy as jnp
from jax.experimental import pallas as pl
from jax.experimental.pallas import tpu as pltpu


def _round_up(n, m):
    return ((n + m - 1) // m) * m


def _cdiv(a, b):
    return (a + b - 1) // b


def _value_net_kernel(obs_ref, tail_ref, w1o_ref, w1t_ref, b1_ref, w2_ref,
                      b2_ref, o_ref):
    """h = relu([obs|tail] @ W1 + b1); out = sum(h * w2, -1) + b2."""
    # Dominant matmul: K = C*H*W (128-aligned).  obs arrives f32 straight from
    # HBM and is cast to bf16 here (VPU, hidden under DMA/MXU), f32 MXU acc.
    x = obs_ref[...].astype(jnp.bfloat16)
    h = jnp.dot(x, w1o_ref[...], preferred_element_type=jnp.float32)
    # Tiny [dis|pos] tail, zero-padded only to K = 16 (full-array-dim block).
    t = tail_ref[...].astype(jnp.bfloat16)
    h = h + jnp.dot(t, w1t_ref[...], preferred_element_type=jnp.float32)
    h = jnp.maximum(h + b1_ref[...], 0.0)            # fp32 bias + ReLU (VPU)
    # fc: Linear(512, 1).  VPU multiply + lane reduction (XLU) instead of an
    # N=1 MXU matmul.
    out = jnp.sum(h * w2_ref[...], axis=-1, keepdims=True) + b2_ref[...]
    o_ref[...] = out.astype(o_ref.dtype)


def value_network_forward(obs, dis, pos, params, *, batch_tile=1024):
    """obs: (B, C, H, W) NCHW; dis: (B, Dd); pos: (B, Dp).  Returns (B, 1) f32."""
    B = obs.shape[0]
    obs_flat = obs.reshape(B, -1)                    # contiguous flatten: no copy
    k_obs = obs_flat.shape[1]                        # C*H*W (1024 here)
    tail = jnp.concatenate([dis.reshape(B, -1), pos.reshape(B, -1)], axis=-1)
    k_tail = tail.shape[1]
    k_tail_pad = _round_up(max(k_tail, 16), 16)      # narrow pad, full-array block

    w1, b1, w2, b2 = params
    assert w1.shape == (k_obs + k_tail, 512) and b1.shape == (1, 512)
    assert w2.shape == (512, 1) and b2.shape == (1, 1)

    # ---- batch tiling -------------------------------------------------------
    batch_tile = max(16, _round_up(batch_tile, 16))
    tb = min(batch_tile, _round_up(B, 16))
    if B > 256 and _cdiv(B, tb) < 2:
        # v7x: keep >= 2 grid steps so ("parallel",) gives the 2nd TC work.
        tb = _round_up(_cdiv(B, 2), 16)
    n_tiles = _cdiv(B, tb)

    # ---- inputs (no bf16 copy, no full-batch pad in HBM) --------------------
    if n_tiles == 1 and B < tb:
        # Tiny single-tile case (e.g. the B=2 demo): cheap host pad so the lone
        # block is fully in-bounds and padded rows are clean zeros.
        obs_in = jnp.zeros((tb, k_obs), obs_flat.dtype).at[:B].set(obs_flat)
        tail_in = jnp.zeros((tb, k_tail_pad), tail.dtype).at[:B, :k_tail].set(tail)
    else:
        # Large B: stream obs as-is; a ragged last block reads past the end,
        # those rows are independent garbage and sliced off by out[:B].
        obs_in = obs_flat
        tail_in = (tail if k_tail == k_tail_pad else
                   jnp.zeros((B, k_tail_pad), tail.dtype).at[:, :k_tail].set(tail))

    # ---- weights (small one-time casts; resident in VMEM via const index_map)
    w1_obs = w1[:k_obs].astype(jnp.bfloat16)
    w1_tail = jnp.zeros((k_tail_pad, 512), jnp.bfloat16)
    w1_tail = w1_tail.at[:k_tail].set(w1[k_obs:].astype(jnp.bfloat16))
    b1_f = b1.astype(jnp.float32)
    w2_row = w2.reshape(1, 512).astype(jnp.float32)  # lane-major for mul+reduce
    b2_f = b2.astype(jnp.float32)

    out = pl.pallas_call(
        _value_net_kernel,
        out_shape=jax.ShapeDtypeStruct((n_tiles * tb, 1), jnp.float32),
        grid=(n_tiles,),
        in_specs=[
            pl.BlockSpec((tb, k_obs), lambda i: (i, 0)),         # obs tile (pipelined, f32)
            pl.BlockSpec((tb, k_tail_pad), lambda i: (i, 0)),    # [dis|pos] tile
            pl.BlockSpec((k_obs, 512), lambda i: (0, 0)),        # W1_obs (resident, bf16)
            pl.BlockSpec((k_tail_pad, 512), lambda i: (0, 0)),   # W1_tail (resident, bf16)
            pl.BlockSpec((1, 512), lambda i: (0, 0)),            # b1
            pl.BlockSpec((1, 512), lambda i: (0, 0)),            # w2^T
            pl.BlockSpec((1, 1), lambda i: (0, 0)),              # b2
        ],
        out_specs=pl.BlockSpec((tb, 1), lambda i: (i, 0)),
        compiler_params=pltpu.CompilerParams(
            dimension_semantics=("parallel",),   # batch split across TCs on v7x
            vmem_limit_bytes=32 * 1024 * 1024,   # ~18 MiB used at tb=1024
        ),
    )(obs_in, tail_in, w1_obs, w1_tail, b1_f, w2_row, b2_f)
    return out[:B]


def init_params(in_features, key):
    """Deterministic parameter init (synthetic; not a checkpoint load)."""
    k1, k2, k3, k4 = jax.random.split(key, 4)
    w1 = jax.random.normal(k1, (in_features, 512), jnp.float32) * 0.02
    b1 = jax.random.normal(k2, (1, 512), jnp.float32) * 0.01
    # fc = nn.Linear(512, 1)
    w2 = jax.random.normal(k3, (512, 1), jnp.float32) * 0.02
    b2 = jax.random.normal(k4, (1, 1), jnp.float32) * 0.01
    return (w1, b1, w2, b2)


if __name__ == "__main__":
    key = jax.random.PRNGKey(0)
    k_obs, k_dis, k_pos, k_par = jax.random.split(key, 4)

    B, C, H, W = 2, 4, 16, 16          # obs: NCHW
    Dd, Dp = 8, 2                      # dis / pos feature dims
    obs = jax.random.normal(k_obs, (B, C, H, W), jnp.float32)
    dis = jax.random.normal(k_dis, (B, Dd), jnp.float32)
    pos = jax.random.normal(k_pos, (B, Dp), jnp.float32)

    F = C * H * W + Dd + Dp
    params = init_params(F, k_par)

    out = value_network_forward(obs, dis, pos, params)
    out = jax.block_until_ready(out)
    assert out.shape == (B, 1)

    # Pure-JAX reference with the same bf16 rounding of the matmul operands
    # (f32 accumulation), so tolerances stay tight.
    x = jnp.concatenate([obs.reshape(B, -1), dis, pos], axis=-1)
    xb = x.astype(jnp.bfloat16).astype(jnp.float32)
    w1b = params[0].astype(jnp.bfloat16).astype(jnp.float32)
    h = jnp.maximum(xb @ w1b + params[1], 0.0)
    ref = h @ params[2] + params[3]
    assert jnp.allclose(out, ref, atol=5e-3, rtol=5e-3)

    print("KERNEL_OK")
</pallas_src>

<mosaic_0001>
module attributes {stable_mosaic.version = 11 : i64} {
  func.func @_value_net_kernel(%arg0: i32, %arg1: memref<16x1024xf32, #tpu.memory_space<vmem>>, %arg2: memref<16x16xf32, #tpu.memory_space<vmem>>, %arg3: memref<1024x512xbf16, #tpu.memory_space<vmem>>, %arg4: memref<16x512xbf16, #tpu.memory_space<vmem>>, %arg5: memref<1x512xf32, #tpu.memory_space<vmem>>, %arg6: memref<1x512xf32, #tpu.memory_space<vmem>>, %arg7: memref<1x1xf32, #tpu.memory_space<vmem>>, %arg8: memref<16x1xf32, #tpu.memory_space<vmem>>) attributes {dimension_semantics = [#tpu.dimension_semantics<parallel>], iteration_bounds = array<i64: 1>, scalar_prefetch = 0 : i64, scratch_operands = 0 : i64, tpu.core_type = #tpu.core_type<tc>, window_params = [{transform_indices = @transform_0, window_bounds = array<i64: 16, 1024>}, {transform_indices = @transform_1, window_bounds = array<i64: 16, 16>}, {pipeline_mode = #tpu.pipeline_mode<synchronous>, transform_indices = @transform_2, window_bounds = array<i64: 1024, 512>}, {pipeline_mode = #tpu.pipeline_mode<synchronous>, transform_indices = @transform_3, window_bounds = array<i64: 16, 512>}, {pipeline_mode = #tpu.pipeline_mode<synchronous>, transform_indices = @transform_4, window_bounds = array<i64: 1, 512>}, {pipeline_mode = #tpu.pipeline_mode<synchronous>, transform_indices = @transform_5, window_bounds = array<i64: 1, 512>}, {pipeline_mode = #tpu.pipeline_mode<synchronous>, transform_indices = @transform_6, window_bounds = array<i64: 1, 1>}, {transform_indices = @transform_7, window_bounds = array<i64: 16, 1>}]} {
    %c0 = arith.constant 0 : index
    %c0_0 = arith.constant 0 : index
    %0 = vector.load %arg1[%c0, %c0_0] : memref<16x1024xf32, #tpu.memory_space<vmem>>, vector<16x1024xf32>
    %1 = arith.truncf %0 : vector<16x1024xf32> to vector<16x1024xbf16>
    %c0_1 = arith.constant 0 : index
    %c0_2 = arith.constant 0 : index
    %2 = vector.load %arg3[%c0_1, %c0_2] : memref<1024x512xbf16, #tpu.memory_space<vmem>>, vector<1024x512xbf16>
    %cst = arith.constant dense<0.000000e+00> : vector<16x512xf32>
    %3 = tpu.matmul %1, %2, %cst {dimension_numbers = #tpu.dot_dimension_numbers<[1], [0], [0], [1], [0, 0, 1, 1], [], []>} : vector<16x1024xbf16>, vector<1024x512xbf16>, vector<16x512xf32> -> vector<16x512xf32>
    %c0_3 = arith.constant 0 : index
    %c0_4 = arith.constant 0 : index
    %4 = vector.load %arg2[%c0_3, %c0_4] : memref<16x16xf32, #tpu.memory_space<vmem>>, vector<16x16xf32>
    %5 = arith.truncf %4 : vector<16x16xf32> to vector<16x16xbf16>
    %c0_5 = arith.constant 0 : index
    %c0_6 = arith.constant 0 : index
    %6 = vector.load %arg4[%c0_5, %c0_6] : memref<16x512xbf16, #tpu.memory_space<vmem>>, vector<16x512xbf16>
    %cst_7 = arith.constant dense<0.000000e+00> : vector<16x512xf32>
    %7 = tpu.matmul %5, %6, %cst_7 {dimension_numbers = #tpu.dot_dimension_numbers<[1], [0], [0], [1], [0, 0, 1, 1], [], []>} : vector<16x16xbf16>, vector<16x512xbf16>, vector<16x512xf32> -> vector<16x512xf32>
    %8 = arith.addf %3, %7 : vector<16x512xf32>
    %c0_8 = arith.constant 0 : index
    %c0_9 = arith.constant 0 : index
    %9 = vector.load %arg5[%c0_8, %c0_9] : memref<1x512xf32, #tpu.memory_space<vmem>>, vector<1x512xf32>
    %10 = vector.broadcast %9 : vector<1x512xf32> to vector<16x512xf32>
    %11 = arith.addf %8, %10 : vector<16x512xf32>
    %cst_10 = arith.constant 0.000000e+00 : f32
    %12 = vector.broadcast %cst_10 : f32 to vector<16x512xf32>
    %13 = arith.maximumf %11, %12 : vector<16x512xf32>
    %c0_11 = arith.constant 0 : index
    %c0_12 = arith.constant 0 : index
    %14 = vector.load %arg6[%c0_11, %c0_12] : memref<1x512xf32, #tpu.memory_space<vmem>>, vector<1x512xf32>
    %15 = vector.broadcast %14 : vector<1x512xf32> to vector<16x512xf32>
    %16 = arith.mulf %13, %15 : vector<16x512xf32>
    %cst_13 = arith.constant dense<0.000000e+00> : vector<16xf32>
    %17 = vector.multi_reduction <add>, %16, %cst_13 [1] : vector<16x512xf32> to vector<16xf32>
    %18 = vector.shape_cast %17 : vector<16xf32> to vector<16x1xf32>
    %c0_14 = arith.constant 0 : index
    %c0_15 = arith.constant 0 : index
    %19 = vector.load %arg7[%c0_14, %c0_15] : memref<1x1xf32, #tpu.memory_space<vmem>>, vector<1x1xf32>
    %20 = vector.broadcast %19 : vector<1x1xf32> to vector<16x1xf32>
    %21 = arith.addf %18, %20 : vector<16x1xf32>
    %c0_16 = arith.constant 0 : index
    %c0_17 = arith.constant 0 : index
    %22 = vector.load %arg8[%c0_16, %c0_17] : memref<16x1xf32, #tpu.memory_space<vmem>>, vector<16x1xf32>
    tpu.vector_store %arg8[%c0_16, %c0_17], %21 {strides = array<i32>} : memref<16x1xf32, #tpu.memory_space<vmem>>, vector<16x1xf32>,
    return
  }
  func.func @transform_0(%arg0: i32) -> (i32, i32) {
    %c0_i32 = arith.constant 0 : i32
    %c0_i32_0 = arith.constant 0 : i32
    return %arg0, %c0_i32 : i32, i32
  }
  func.func @transform_1(%arg0: i32) -> (i32, i32) {
    %c0_i32 = arith.constant 0 : i32
    %c0_i32_0 = arith.constant 0 : i32
    return %arg0, %c0_i32 : i32, i32
  }
  func.func @transform_2(%arg0: i32) -> (i32, i32) {
    %c0_i32 = arith.constant 0 : i32
    %c0_i32_0 = arith.constant 0 : i32
    %c0_i32_1 = arith.constant 0 : i32
    return %c0_i32, %c0_i32_0 : i32, i32
  }
  func.func @transform_3(%arg0: i32) -> (i32, i32) {
    %c0_i32 = arith.constant 0 : i32
    %c0_i32_0 = arith.constant 0 : i32
    %c0_i32_1 = arith.constant 0 : i32
    return %c0_i32, %c0_i32_0 : i32, i32
  }
  func.func @transform_4(%arg0: i32) -> (i32, i32) {
    %c0_i32 = arith.constant 0 : i32
    %c0_i32_0 = arith.constant 0 : i32
    %c0_i32_1 = arith.constant 0 : i32
    return %c0_i32, %c0_i32_0 : i32, i32
  }
  func.func @transform_5(%arg0: i32) -> (i32, i32) {
    %c0_i32 = arith.constant 0 : i32
    %c0_i32_0 = arith.constant 0 : i32
    %c0_i32_1 = arith.constant 0 : i32
    return %c0_i32, %c0_i32_0 : i32, i32
  }
  func.func @transform_6(%arg0: i32) -> (i32, i32) {
    %c0_i32 = arith.constant 0 : i32
    %c0_i32_0 = arith.constant 0 : i32
    %c0_i32_1 = arith.constant 0 : i32
    return %c0_i32, %c0_i32_0 : i32, i32
  }
  func.func @transform_7(%arg0: i32) -> (i32, i32) {
    %c0_i32 = arith.constant 0 : i32
    %c0_i32_0 = arith.constant 0 : i32
    return %arg0, %c0_i32 : i32, i32
  }
}

</mosaic_0001>

<bundles_post_ra>
// kernel: tpu_custom_call.1
= control target key start
LH: loop header
LB: loop body
LE: loop exit
PB: predicated region body
PF: predicated region fallthrough
CT: control target
= control target key end

     0   :  { %s3896_s0 = inlined_call_operand.hbm [shape: f32[16,1024], index: 0, kind: input, shape index: {}]   ;;  %s3897_s1 = inlined_call_operand.hbm [shape: f32[16,16], index: 1, kind: input, shape index: {}]   ;;  %s3898_s2 = inlined_call_operand.hbm [shape: bf16[1024,512], index: 2, kind: input, shape index: {}]   ;;  %s3899_s3 = inlined_call_operand.hbm [shape: bf16[16,512], index: 3, kind: input, shape index: {}]   ;;  %s3900_s4 = inlined_call_operand.vmem [shape: f32[1,512], index: 4, kind: input, shape index: {}]   ;;  %s3901_s5 = inlined_call_operand.hbm [shape: f32[1,512], index: 5, kind: input, shape index: {}]   ;;  %s3902_s6 = inlined_call_operand.<no memory space> [shape: f32[1,1], index: 6, kind: input, shape index: {}]   ;;  %s3903_s7 = inlined_call_operand.vmem [shape: f32[16,1], index: 7, kind: output, shape index: {}]  }
   0x1   :  { %v12_v0 = vstv %s3902_s6 }
   0x2   :  { %13 = vst [vmem:[#allocation2] sm:$0x1] %v12_v0 }
   0x3   :  { %14 = vsyncpa [#allocation4], 0 }
   0x4   :  { %15 = vsyncpa [#allocation6], 0  ;;  %s34_s28 = sshll.u32 %s3897_s1, 4  ;;  %s35_s28 = int_to_ptr.hbm [resolvable:$true] %s34_s28 }
   0x5   :  { %16 = vsyncpa [#allocation9], 0  ;;  %s3712_s29 = smov [#allocation5]   ;;  %s3713_s8 = smov 128  }
   0x6   :  { %s36_s30 = sshll.u32 %s3712_s29, 4  ;;  %s3714_s9 = smov 8   ;;  %s37_s30 = int_to_ptr.vmem [resolvable:$true] %s36_s30 }
   0x7   :  { %42 = dma.hbm_to_vmem [thread:$0]  %s35_s28, 256, %s37_s30, [#allocation6], %s3713_s8, %s3713_s8, %s3714_s9  }
   0x8   :  { %s60_s12 = sshll.u32 %s3899_s3, 4  ;;  %s3715_s6 = smov [#allocation8]   ;;  %s61_s12 = int_to_ptr.hbm [resolvable:$true] %s60_s12 }
   0x9   :  { %s62_s13 = sshll.u32 %s3715_s6, 4  ;;  %s21_s16 = sshll.u32 %s3896_s0, 4  ;;  %s63_s13 = int_to_ptr.vmem [resolvable:$true] %s62_s13  ;;  %s22_s16 = int_to_ptr.hbm [resolvable:$true] %s21_s16 }
   0xa   :  { %s3716_s1 = smov 256   ;;  %s3717_s17 = smov 16  }
   0xb   :  { %68 = dma.hbm_to_vmem [thread:$0]  %s61_s12, 512, %s63_s13, [#allocation9], %s3716_s1, %s3716_s1, %s3717_s17  }
   0xc   :  { %s3718_s18 = smov [#allocation3]   ;;  %s47_s22 = sshll.u32 %s3898_s2, 4  ;;  %s48_s22 = int_to_ptr.hbm [resolvable:$true] %s47_s22 }
   0xd   :  { %s23_s19 = sshll.u32 %s3718_s18, 4  ;;  %s3719_s3 = smov 1024   ;;  %s24_s19 = int_to_ptr.vmem [resolvable:$true] %s23_s19 }
   0xe   :  { %s3720_s23 = smov 64   ;;  %s3721_s24 = smov [#allocation7]  }
   0xf   :  { %29 = dma.hbm_to_vmem [thread:$0]  %s22_s16, 2048, %s24_s19, [#allocation4], %s3719_s3, %s3719_s3, %s3720_s23  }
  0x10   :  { %s49_s25 = sshll.u32 %s3721_s24, 4  ;;  %s76_s27 = sshll.u32 %s3901_s5, 4  ;;  %s50_s25 = int_to_ptr.vmem [resolvable:$true] %s49_s25  ;;  %s77_s27 = int_to_ptr.hbm [resolvable:$true] %s76_s27 }
  0x11   :  { %55 = dma.hbm_to_vmem [thread:$0]  %s48_s22, 32768, %s50_s25, [#allocation6], %s3716_s1, %s3716_s1, %s3717_s17  }
  0x12   :  { %s3722_s28 = smov [#allocation10]  }
  0x13   :  { %s78_s29 = sshll.u32 %s3722_s28, 4  ;;  %s79_s29 = int_to_ptr.vmem [resolvable:$true] %s78_s29 }
  0x14   :  { %81 = dma.hbm_to_vmem [thread:$0]  %s77_s27, 64, %s79_s29, [#allocation9]  }
  0x15   :  { %3706 = dma.done.wait [#allocation4], 2048  }
  0x16   :  { %3707 = vsyncadd [#allocation4], 4294965248 }
  0x17   :  { %3708 = dma.done.wait [#allocation6], 33024  }
  0x18   :  { %3709 = vsyncadd [#allocation6], 4294934272 }
  0x19   :  { %3710 = dma.done.wait [#allocation9], 576  }
  0x1a   :  { %3711 = vsyncadd [#allocation9], 4294966720  ;;  %v2272_v1 = vld [vmem:[#allocation8] sm:$0xf]  ;;  %v3572_v2 = vld [vmem:[#allocation8 + $0xc] sm:$0xf0] }
  0x1b   :  { %v3570_v3 = vld [vmem:[#allocation8 + $0x4] sm:$0xf]  ;;  %v2273_v4 = vor.u32 %v3572_v2, %v2272_v1  ;;  %v2274_v5 = vld [vmem:[#allocation8 + $0x10] sm:$0xf0]  ;;  %v2280_v6 = vld [vmem:[#allocation8 + $0x8] sm:$0xf] }
  0x1c   :  { %v3573_v7 = vld [vmem:[#allocation8 + $0x14] sm:$0xf0]  ;;  %v2277_v8 = vor.u32 %v3570_v3, %v2274_v5  ;;  %v3571_v10 = vld [vmem:[#allocation8 + $0xc] sm:$0xf]  ;;  %v2282_v11 = vld [vmem:[#allocation8 + $0x18] sm:$0xf0] }
  0x1d   :  { %v2281_v9 = vor.u32 %v3573_v7, %v2280_v6  ;;  %v2404_v12 = vld [vmem:[#allocation7 + $0xe0] sm:$0xf]  ;;  %423 = vmatpush.bf16.msra.mxu0 %v2273_v4  ;;  %v2285_v13 = vor.u32 %v3571_v10, %v2282_v11  ;;  %v3344_v14 = vld [vmem:[#allocation7 + $0xec] sm:$0xf0]  ;;  %v386_v58 = vld [vmem:[#allocation5 + $0x8] sm:$0xff]  ;;  %vm412_vm0 = vcmask 130048  }
  0x1e   :  { %v2532_v15 = vld [vmem:[#allocation7 + $0x1e0] sm:$0xf]  ;;  %v3376_v16 = vld [vmem:[#allocation7 + $0x1ec] sm:$0xf0]  ;;  %437 = vmatpush.bf16.msra.mxu1 %v2277_v8  ;;  %v2405_v17 = vor.u32 %v3344_v14, %v2404_v12  ;;  %vm2260_vm1 = vcmask 7168  }
  0x1f   :  { %451 = vmatpush.bf16.msra.mxu2 %v2281_v9  ;;  %v2533_v18 = vor.u32 %v3376_v16, %v2532_v15  ;;  %v2660_v19 = vld [vmem:[#allocation7 + $0x2e0] sm:$0xf]  ;;  %v3408_v20 = vld [vmem:[#allocation7 + $0x2ec] sm:$0xf0]  ;;  %465 = vmatpush.bf16.msra.mxu3 %v2285_v13 }
  0x20   :  { %v2788_v21 = vld [vmem:[#allocation7 + $0x3e0] sm:$0xf]  ;;  %v2661_v22 = vor.u32 %v3408_v20, %v2660_v19  ;;  %v3440_v23 = vld [vmem:[#allocation7 + $0x3ec] sm:$0xf0] }
  0x21   :  { %v2388_v24 = vld [vmem:[#allocation7 + $0xc0] sm:$0xf]  ;;  %v3340_v25 = vld [vmem:[#allocation7 + $0xcc] sm:$0xf0]  ;;  %1752 = vmatpush.bf16.msrb.mxu0 %v2405_v17  ;;  %v2789_v26 = vor.u32 %v3440_v23, %v2788_v21 }
  0x22   :  { %1766 = vmatpush.bf16.msrb.mxu1 %v2533_v18  ;;  %v2389_v27 = vor.u32 %v3340_v25, %v2388_v24  ;;  %v2516_v28 = vld [vmem:[#allocation7 + $0x1c0] sm:$0xf]  ;;  %v3372_v29 = vld [vmem:[#allocation7 + $0x1cc] sm:$0xf0] }
  0x23   :  { %v2644_v30 = vld [vmem:[#allocation7 + $0x2c0] sm:$0xf]  ;;  %1780 = vmatpush.bf16.msrb.mxu2 %v2661_v22  ;;  %v2517_v31 = vor.u32 %v3372_v29, %v2516_v28  ;;  %v3404_v32 = vld [vmem:[#allocation7 + $0x2cc] sm:$0xf0]  ;;  %1794 = vmatpush.bf16.msrb.mxu3 %v2789_v26 }
  0x24   :  { %v2772_v33 = vld [vmem:[#allocation7 + $0x3c0] sm:$0xf]  ;;  %v3436_v34 = vld [vmem:[#allocation7 + $0x3cc] sm:$0xf0]  ;;  %v2645_v35 = vor.u32 %v3404_v32, %v2644_v30 }
  0x25   :  { %v2773_v36 = vor.u32 %v3436_v34, %v2772_v33  ;;  %v2372_v37 = vld [vmem:[#allocation7 + $0xa0] sm:$0xf]  ;;  %v3336_v38 = vld [vmem:[#allocation7 + $0xac] sm:$0xf0]  ;;  %1753 = vmatpush.bf16.msrb.mxu0 %v2389_v27 }
  0x26   :  { %v2500_v39 = vld [vmem:[#allocation7 + $0x1a0] sm:$0xf]  ;;  %v3368_v40 = vld [vmem:[#allocation7 + $0x1ac] sm:$0xf0]  ;;  %1767 = vmatpush.bf16.msrb.mxu1 %v2517_v31  ;;  %v2373_v43 = vor.u32 %v3336_v38, %v2372_v37 }
  0x27   :  { %v2628_v41 = vld [vmem:[#allocation7 + $0x2a0] sm:$0xf]  ;;  %v3400_v42 = vld [vmem:[#allocation7 + $0x2ac] sm:$0xf0]  ;;  %v2501_v44 = vor.u32 %v3368_v40, %v2500_v39  ;;  %1781 = vmatpush.bf16.msrb.mxu2 %v2645_v35  ;;  %1795 = vmatpush.bf16.msrb.mxu3 %v2773_v36 }
  0x28   :  { %v2756_v45 = vld [vmem:[#allocation7 + $0x3a0] sm:$0xf]  ;;  %v3432_v46 = vld [vmem:[#allocation7 + $0x3ac] sm:$0xf0]  ;;  %v2629_v48 = vor.u32 %v3400_v42, %v2628_v41 }
  0x29   :  { %v2356_v47 = vld [vmem:[#allocation7 + $0x80] sm:$0xf]  ;;  %v3332_v49 = vld [vmem:[#allocation7 + $0x8c] sm:$0xf0]  ;;  %v2757_v52 = vor.u32 %v3432_v46, %v2756_v45  ;;  %1754 = vmatpush.bf16.msrb.mxu0 %v2373_v43 }
  0x2a   :  { %v2484_v50 = vld [vmem:[#allocation7 + $0x180] sm:$0xf]  ;;  %v3364_v51 = vld [vmem:[#allocation7 + $0x18c] sm:$0xf0]  ;;  %1768 = vmatpush.bf16.msrb.mxu1 %v2501_v44  ;;  %v2357_v59 = vor.u32 %v3332_v49, %v2356_v47 }
  0x2b   :  { %v2612_v53 = vld [vmem:[#allocation7 + $0x280] sm:$0xf]  ;;  %v3396_v54 = vld [vmem:[#allocation7 + $0x28c] sm:$0xf0]  ;;  %v2485_v60 = vor.u32 %v3364_v51, %v2484_v50  ;;  %1782 = vmatpush.bf16.msrb.mxu2 %v2629_v48  ;;  %1796 = vmatpush.bf16.msrb.mxu3 %v2757_v52 }
  0x2c   :  { %v2740_v55 = vld [vmem:[#allocation7 + $0x380] sm:$0xf]  ;;  %v3428_v56 = vld [vmem:[#allocation7 + $0x38c] sm:$0xf0]  ;;  %v2613_v63 = vor.u32 %v3396_v54, %v2612_v53 }
  0x2d   :  { %v385_v57 = vld [vmem:[#allocation5] sm:$0xff]  ;;  %v2340_v62 = vld [vmem:[#allocation7 + $0x60] sm:$0xf]  ;;  %v2741_v3 = vor.u32 %v3428_v56, %v2740_v55  ;;  %1755 = vmatpush.bf16.msrb.mxu0 %v2357_v59 }
  0x2e   :  { %v387_v61 = vpack.c.bf16 %v386_v58, %v385_v57  ;;  %v3328_v0 = vld [vmem:[#allocation7 + $0x6c] sm:$0xf0]  ;;  %v2468_v1 = vld [vmem:[#allocation7 + $0x160] sm:$0xf]  ;;  %1769 = vmatpush.bf16.msrb.mxu1 %v2485_v60  ;;  %v106_v60 = vld [vmem:[#allocation3 + $0x8] sm:$0xff] }
  0x2f   :  { %v3360_v2 = vld [vmem:[#allocation7 + $0x16c] sm:$0xf0]  ;;  %v2596_v4 = vld [vmem:[#allocation7 + $0x260] sm:$0xf]  ;;  %v2341_v8 = vor.u32 %v3328_v0, %v2340_v62  ;;  %1783 = vmatpush.bf16.msrb.mxu2 %v2613_v63  ;;  %1797 = vmatpush.bf16.msrb.mxu3 %v2741_v3  ;;  %v108_v62 = vld [vmem:[#allocation3 + $0x18] sm:$0xff] }
  0x30   :  { %2286 = vmatmul.msk.bf16.vlgmr.msra.gmra.mxu0 %vm412_vm0, %v387_v61  ;;  %v3392_v5 = vld [vmem:[#allocation7 + $0x26c] sm:$0xf0]  ;;  %2288 = vmatmul.msk.bf16.vlgmr.msra.gmra.mxu2 %vm412_vm0, %v387_v61  ;;  %v2724_v6 = vld [vmem:[#allocation7 + $0x360] sm:$0xf]  ;;  %v2469_v9 = vor.u32 %v3360_v2, %v2468_v1  ;;  %v116_v1 = vld [vmem:[#allocation3 + $0x58] sm:$0xff] }
  0x31   :  { %v3424_v7 = vld [vmem:[#allocation7 + $0x36c] sm:$0xf0]  ;;  %2287 = vmatmul.msk.bf16.vlgmr.msra.gmra.mxu1 %vm412_vm0, %v387_v61  ;;  %v2324_v10 = vld [vmem:[#allocation7 + $0x40] sm:$0xf]  ;;  %v2597_v11 = vor.u32 %v3392_v5, %v2596_v4  ;;  %2289 = vmatmul.msk.bf16.vlgmr.msra.gmra.mxu3 %vm412_vm0, %v387_v61  ;;  %v114_v61 = vld [vmem:[#allocation3 + $0x48] sm:$0xff] }
  0x32   :  { %v3324_v12 = vld [vmem:[#allocation7 + $0x4c] sm:$0xf0]  ;;  %v2452_v13 = vld [vmem:[#allocation7 + $0x140] sm:$0xf]  ;;  %v2725_v15 = vor.u32 %v3424_v7, %v2724_v6  ;;  %1756 = vmatpush.bf16.msrb.mxu0 %v2341_v8  ;;  %1770 = vmatpush.bf16.msrb.mxu1 %v2469_v9 }
  0x33   :  { %v3356_v14 = vld [vmem:[#allocation7 + $0x14c] sm:$0xf0]  ;;  %v2580_v16 = vld [vmem:[#allocation7 + $0x240] sm:$0xf]  ;;  %v2325_v20 = vor.u32 %v3324_v12, %v2324_v10  ;;  %1784 = vmatpush.bf16.msrb.mxu2 %v2597_v11 }
  0x34   :  { %v3388_v17 = vld [vmem:[#allocation7 + $0x24c] sm:$0xf0]  ;;  %v2708_v18 = vld [vmem:[#allocation7 + $0x340] sm:$0xf]  ;;  %v2453_v21 = vor.u32 %v3356_v14, %v2452_v13  ;;  %1798 = vmatpush.bf16.msrb.mxu3 %v2725_v15  ;;  %v3789_v14 = vpack.c.bf16 %v114_v61, %v106_v60  ;;  %v3791_v15 = vpack.c.bf16 %v116_v1, %v108_v62 }
  0x35   :  { %v3420_v19 = vld [vmem:[#allocation7 + $0x34c] sm:$0xf0]  ;;  %v2308_v22 = vld [vmem:[#allocation7 + $0x20] sm:$0xf]  ;;  %v2581_v24 = vor.u32 %v3388_v17, %v2580_v16 }
  0x36   :  { %v3320_v23 = vld [vmem:[#allocation7 + $0x2c] sm:$0xf0]  ;;  %v2436_v25 = vld [vmem:[#allocation7 + $0x120] sm:$0xf]  ;;  %v2709_v28 = vor.u32 %v3420_v19, %v2708_v18  ;;  %1757 = vmatpush.bf16.msrb.mxu0 %v2325_v20  ;;  %1771 = vmatpush.bf16.msrb.mxu1 %v2453_v21 }
  0x37   :  { %v3352_v26 = vld [vmem:[#allocation7 + $0x12c] sm:$0xf0]  ;;  %v2564_v27 = vld [vmem:[#allocation7 + $0x220] sm:$0xf]  ;;  %v2309_v35 = vor.u32 %v3320_v23, %v2308_v22  ;;  %1785 = vmatpush.bf16.msrb.mxu2 %v2581_v24 }
  0x38   :  { %v3384_v29 = vld [vmem:[#allocation7 + $0x22c] sm:$0xf0]  ;;  %v2692_v30 = vld [vmem:[#allocation7 + $0x320] sm:$0xf]  ;;  %v2437_v36 = vor.u32 %v3352_v26, %v2436_v25  ;;  %1799 = vmatpush.bf16.msrb.mxu3 %v2709_v28 }
  0x39   :  { %v3416_v31 = vld [vmem:[#allocation7 + $0x32c] sm:$0xf0]  ;;  %v2292_v32 = vld [vmem:[#allocation7] sm:$0xf]  ;;  %v2565_v40 = vor.u32 %v3384_v29, %v2564_v27 }
  0x3a   :  { %v3316_v33 = vld [vmem:[#allocation7 + $0xc] sm:$0xf0]  ;;  %v2420_v34 = vld [vmem:[#allocation7 + $0x100] sm:$0xf]  ;;  %v2693_v46 = vor.u32 %v3416_v31, %v2692_v30  ;;  %1758 = vmatpush.bf16.msrb.mxu0 %v2309_v35  ;;  %1772 = vmatpush.bf16.msrb.mxu1 %v2437_v36 }
  0x3b   :  { %v3348_v37 = vld [vmem:[#allocation7 + $0x10c] sm:$0xf0]  ;;  %v2548_v38 = vld [vmem:[#allocation7 + $0x200] sm:$0xf]  ;;  %v2293_v53 = vor.u32 %v3316_v33, %v2292_v32  ;;  %1786 = vmatpush.bf16.msrb.mxu2 %v2565_v40 }
  0x3c   :  { %v3380_v39 = vld [vmem:[#allocation7 + $0x20c] sm:$0xf0]  ;;  %v2676_v41 = vld [vmem:[#allocation7 + $0x300] sm:$0xf]  ;;  %v2421_v54 = vor.u32 %v3348_v37, %v2420_v34  ;;  %1800 = vmatpush.bf16.msrb.mxu3 %v2693_v46 }
  0x3d   :  { %v3412_v42 = vld [vmem:[#allocation7 + $0x30c] sm:$0xf0]  ;;  %v2916_v43 = vld [vmem:[#allocation7 + $0x4e0] sm:$0xf]  ;;  %v2549_v58 = vor.u32 %v3380_v39, %v2548_v38 }
  0x3e   :  { %v3472_v44 = vld [vmem:[#allocation7 + $0x4ec] sm:$0xf0]  ;;  %v3044_v45 = vld [vmem:[#allocation7 + $0x5e0] sm:$0xf]  ;;  %v2677_v63 = vor.u32 %v3412_v42, %v2676_v41  ;;  %1759 = vmatpush.bf16.msrb.mxu0 %v2293_v53  ;;  %1773 = vmatpush.bf16.msrb.mxu1 %v2421_v54 }
  0x3f   :  { %v3504_v47 = vld [vmem:[#allocation7 + $0x5ec] sm:$0xf0]  ;;  %v3172_v48 = vld [vmem:[#allocation7 + $0x6e0] sm:$0xf]  ;;  %v2917_v59 = vor.u32 %v3472_v44, %v2916_v43  ;;  %1787 = vmatpush.bf16.msrb.mxu2 %v2549_v58 }
  0x40   :  { %v3536_v49 = vld [vmem:[#allocation7 + $0x6ec] sm:$0xf0]  ;;  %v3300_v50 = vld [vmem:[#allocation7 + $0x7e0] sm:$0xf]  ;;  %v3045_v0 = vor.u32 %v3504_v47, %v3044_v45  ;;  %1801 = vmatpush.bf16.msrb.mxu3 %v2677_v63 }
  0x41   :  { %v3568_v51 = vld [vmem:[#allocation7 + $0x7ec] sm:$0xf0]  ;;  %v107_v56 = vld [vmem:[#allocation3 + $0x10] sm:$0xff]  ;;  %v3173_v4 = vor.u32 %v3536_v49, %v3172_v48  ;;  %1774 = vmatmul.bf16.vlgmr.msrb.gmra.mxu1 %v3789_v14 }
  0x42   :  { %v105_v52 = vld [vmem:[#allocation3] sm:$0xff]  ;;  %v115_v57 = vld [vmem:[#allocation3 + $0x50] sm:$0xff]  ;;  %v3301_v5 = vor.u32 %v3568_v51, %v3300_v50  ;;  %1808 = vmatpush.bf16.msra.mxu0 %v2917_v59  ;;  %1822 = vmatpush.bf16.msra.mxu1 %v3045_v0 }
  0x43   :  { %v113_v55 = vld [vmem:[#allocation3 + $0x40] sm:$0xff]  ;;  %v2900_v2 = vld [vmem:[#allocation7 + $0x4c0] sm:$0xf]  ;;  %v3787_v10 = vpack.c.bf16 %v115_v57, %v107_v56  ;;  %1836 = vmatpush.bf16.msra.mxu2 %v3173_v4  ;;  %1802 = vmatmul.bf16.vlgmr.msrb.gmra.mxu3 %v3791_v15 }
  0x44   :  { %v3468_v3 = vld [vmem:[#allocation7 + $0x4cc] sm:$0xf0]  ;;  %v3028_v6 = vld [vmem:[#allocation7 + $0x5c0] sm:$0xf]  ;;  %v3785_v9 = vpack.c.bf16 %v113_v55, %v105_v52  ;;  %1850 = vmatpush.bf16.msra.mxu3 %v3301_v5 }
  0x45   :  { %v3500_v7 = vld [vmem:[#allocation7 + $0x5cc] sm:$0xf0]  ;;  %v3156_v8 = vld [vmem:[#allocation7 + $0x6c0] sm:$0xf]  ;;  %v2901_v16 = vor.u32 %v3468_v3, %v2900_v2  ;;  %1788 = vmatmul.bf16.vlgmr.msrb.gmra.mxu2 %v3787_v10 }
  0x46   :  { %v3532_v11 = vld [vmem:[#allocation7 + $0x6cc] sm:$0xf0]  ;;  %v3284_v12 = vld [vmem:[#allocation7 + $0x7c0] sm:$0xf]  ;;  %v3029_v17 = vor.u32 %v3500_v7, %v3028_v6  ;;  %1760 = vmatmul.bf16.vlgmr.msrb.gmra.mxu0 %v3785_v9 }
  0x47   :  { %v3564_v13 = vld [vmem:[#allocation7 + $0x7cc] sm:$0xf0]  ;;  %v2884_v18 = vld [vmem:[#allocation7 + $0x4a0] sm:$0xf]  ;;  %v3157_v20 = vor.u32 %v3532_v11, %v3156_v8  ;;  %1809 = vmatpush.bf16.msra.mxu0 %v2901_v16 }
  0x48   :  { %v3464_v19 = vld [vmem:[#allocation7 + $0x4ac] sm:$0xf0]  ;;  %v3285_v21 = vor.u32 %v3564_v13, %v3284_v12  ;;  %v3012_v22 = vld [vmem:[#allocation7 + $0x5a0] sm:$0xf]  ;;  %1823 = vmatpush.bf16.msra.mxu1 %v3029_v17 }
  0x49   :  { %v3496_v23 = vld [vmem:[#allocation7 + $0x5ac] sm:$0xf0]  ;;  %v3140_v24 = vld [vmem:[#allocation7 + $0x6a0] sm:$0xf]  ;;  %v2885_v28 = vor.u32 %v3464_v19, %v2884_v18  ;;  %1837 = vmatpush.bf16.msra.mxu2 %v3157_v20 }
  0x4a   :  { %v3528_v25 = vld [vmem:[#allocation7 + $0x6ac] sm:$0xf0]  ;;  %v3268_v26 = vld [vmem:[#allocation7 + $0x7a0] sm:$0xf]  ;;  %v3013_v29 = vor.u32 %v3496_v23, %v3012_v22  ;;  %1851 = vmatpush.bf16.msra.mxu3 %v3285_v21 }
  0x4b   :  { %v3560_v27 = vld [vmem:[#allocation7 + $0x7ac] sm:$0xf0]  ;;  %v2868_v30 = vld [vmem:[#allocation7 + $0x480] sm:$0xf]  ;;  %v3141_v32 = vor.u32 %v3528_v25, %v3140_v24  ;;  %1810 = vmatpush.bf16.msra.mxu0 %v2885_v28  ;;  %v3342_v28 = vld [vmem:[#allocation7 + $0xe4] sm:$0xf] }
  0x4c   :  { %v3460_v31 = vld [vmem:[#allocation7 + $0x48c] sm:$0xf0]  ;;  %v3269_v33 = vor.u32 %v3560_v27, %v3268_v26  ;;  %v2996_v34 = vld [vmem:[#allocation7 + $0x580] sm:$0xf]  ;;  %1824 = vmatpush.bf16.msra.mxu1 %v3013_v29  ;;  %v2406_v29 = vld [vmem:[#allocation7 + $0xf0] sm:$0xf0] }
  0x4d   :  { %v3492_v35 = vld [vmem:[#allocation7 + $0x58c] sm:$0xf0]  ;;  %v3124_v36 = vld [vmem:[#allocation7 + $0x680] sm:$0xf]  ;;  %v2869_v40 = vor.u32 %v3460_v31, %v2868_v30  ;;  %1838 = vmatpush.bf16.msra.mxu2 %v3141_v32  ;;  %v3374_v30 = vld [vmem:[#allocation7 + $0x1e4] sm:$0xf] }
  0x4e   :  { %v3524_v37 = vld [vmem:[#allocation7 + $0x68c] sm:$0xf0]  ;;  %v3252_v38 = vld [vmem:[#allocation7 + $0x780] sm:$0xf]  ;;  %v2997_v41 = vor.u32 %v3492_v35, %v2996_v34  ;;  %1852 = vmatpush.bf16.msra.mxu3 %v3269_v33  ;;  %v2534_v31 = vld [vmem:[#allocation7 + $0x1f0] sm:$0xf0] }
  0x4f   :  { %v3556_v39 = vld [vmem:[#allocation7 + $0x78c] sm:$0xf0]  ;;  %v2852_v42 = vld [vmem:[#allocation7 + $0x460] sm:$0xf]  ;;  %v3125_v44 = vor.u32 %v3524_v37, %v3124_v36  ;;  %1811 = vmatpush.bf16.msra.mxu0 %v2869_v40  ;;  %v3406_v32 = vld [vmem:[#allocation7 + $0x2e4] sm:$0xf] }
  0x50   :  { %v3456_v43 = vld [vmem:[#allocation7 + $0x46c] sm:$0xf0]  ;;  %v3253_v45 = vor.u32 %v3556_v39, %v3252_v38  ;;  %v2980_v46 = vld [vmem:[#allocation7 + $0x560] sm:$0xf]  ;;  %1825 = vmatpush.bf16.msra.mxu1 %v2997_v41  ;;  %v2662_v33 = vld [vmem:[#allocation7 + $0x2f0] sm:$0xf0] }
  0x51   :  { %v3488_v47 = vld [vmem:[#allocation7 + $0x56c] sm:$0xf0]  ;;  %v3108_v48 = vld [vmem:[#allocation7 + $0x660] sm:$0xf]  ;;  %v2853_v52 = vor.u32 %v3456_v43, %v2852_v42  ;;  %1839 = vmatpush.bf16.msra.mxu2 %v3125_v44  ;;  %v3438_v34 = vld [vmem:[#allocation7 + $0x3e4] sm:$0xf] }
  0x52   :  { %v3520_v49 = vld [vmem:[#allocation7 + $0x66c] sm:$0xf0]  ;;  %v3236_v50 = vld [vmem:[#allocation7 + $0x760] sm:$0xf]  ;;  %v2981_v53 = vor.u32 %v3488_v47, %v2980_v46  ;;  %1853 = vmatpush.bf16.msra.mxu3 %v3253_v45  ;;  %v2790_v35 = vld [vmem:[#allocation7 + $0x3f0] sm:$0xf0]  ;;  %v2409_v47 = vor.u32 %v3342_v28, %v2406_v29 }
  0x53   :  { %v3552_v51 = vld [vmem:[#allocation7 + $0x76c] sm:$0xf0]  ;;  %v2836_v54 = vld [vmem:[#allocation7 + $0x440] sm:$0xf]  ;;  %v3109_v56 = vor.u32 %v3520_v49, %v3108_v48  ;;  %1812 = vmatpush.bf16.msra.mxu0 %v2853_v52  ;;  %v110_v44 = vld [vmem:[#allocation3 + $0x28] sm:$0xff]  ;;  %v2537_v48 = vor.u32 %v3374_v30, %v2534_v31  ;;  %v2665_v52 = vor.u32 %v3406_v32, %v2662_v33 }
  0x54   :  { %v3452_v55 = vld [vmem:[#allocation7 + $0x44c] sm:$0xf0]  ;;  %v3237_v57 = vor.u32 %v3552_v51, %v3236_v50  ;;  %v2964_v58 = vld [vmem:[#allocation7 + $0x540] sm:$0xf]  ;;  %1826 = vmatpush.bf16.msra.mxu1 %v2981_v53  ;;  %v118_v45 = vld [vmem:[#allocation3 + $0x68] sm:$0xff]  ;;  %v2793_v53 = vor.u32 %v3438_v34, %v2790_v35 }
  0x55   :  { %v3484_v59 = vld [vmem:[#allocation7 + $0x54c] sm:$0xf0]  ;;  %v3092_v60 = vld [vmem:[#allocation7 + $0x640] sm:$0xf]  ;;  %v2837_v0 = vor.u32 %v3452_v55, %v2836_v54  ;;  %1840 = vmatpush.bf16.msra.mxu2 %v3109_v56  ;;  %v112_v46 = vld [vmem:[#allocation3 + $0x38] sm:$0xff] }
  0x56   :  { %v3516_v61 = vld [vmem:[#allocation7 + $0x64c] sm:$0xf0]  ;;  %v3220_v62 = vld [vmem:[#allocation7 + $0x740] sm:$0xf]  ;;  %v2965_v1 = vor.u32 %v3484_v59, %v2964_v58  ;;  %1854 = vmatpush.bf16.msra.mxu3 %v3237_v57  ;;  %v120_v49 = vld [vmem:[#allocation3 + $0x78] sm:$0xff] }
  0x57   :  { %v3548_v63 = vld [vmem:[#allocation7 + $0x74c] sm:$0xf0]  ;;  %v2820_v2 = vld [vmem:[#allocation7 + $0x420] sm:$0xf]  ;;  %v3093_v4 = vor.u32 %v3516_v61, %v3092_v60  ;;  %1813 = vmatpush.bf16.msra.mxu0 %v2837_v0  ;;  %v3338_v50 = vld [vmem:[#allocation7 + $0xc4] sm:$0xf] }
  0x58   :  { %v3448_v3 = vld [vmem:[#allocation7 + $0x42c] sm:$0xf0]  ;;  %v3221_v5 = vor.u32 %v3548_v63, %v3220_v62  ;;  %v2948_v6 = vld [vmem:[#allocation7 + $0x520] sm:$0xf]  ;;  %1827 = vmatpush.bf16.msra.mxu1 %v2965_v1  ;;  %v2390_v51 = vld [vmem:[#allocation7 + $0xd0] sm:$0xf0]  ;;  %v3801_v62 = vpack.c.bf16 %v118_v45, %v110_v44  ;;  %v3803_v63 = vpack.c.bf16 %v120_v49, %v112_v46 }
  0x59   :  { %v3480_v7 = vld [vmem:[#allocation7 + $0x52c] sm:$0xf0]  ;;  %v3076_v8 = vld [vmem:[#allocation7 + $0x620] sm:$0xf]  ;;  %v2821_v20 = vor.u32 %v3448_v3, %v2820_v2  ;;  %1841 = vmatpush.bf16.msra.mxu2 %v3093_v4  ;;  %v3370_v54 = vld [vmem:[#allocation7 + $0x1c4] sm:$0xf]  ;;  %v2393_v0 = vor.u32 %v3338_v50, %v2390_v51 }
  0x5a   :  { %v3512_v11 = vld [vmem:[#allocation7 + $0x62c] sm:$0xf0]  ;;  %v3204_v12 = vld [vmem:[#allocation7 + $0x720] sm:$0xf]  ;;  %v2949_v21 = vor.u32 %v3480_v7, %v2948_v6  ;;  %1855 = vmatpush.bf16.msra.mxu3 %v3221_v5  ;;  %v2518_v55 = vld [vmem:[#allocation7 + $0x1d0] sm:$0xf0] }
  0x5b   :  { %v3544_v13 = vld [vmem:[#allocation7 + $0x72c] sm:$0xf0]  ;;  %v2804_v16 = vld [vmem:[#allocation7 + $0x400] sm:$0xf]  ;;  %v3077_v26 = vor.u32 %v3512_v11, %v3076_v8  ;;  %1814 = vmatpush.bf16.msra.mxu0 %v2821_v20  ;;  %v3402_v56 = vld [vmem:[#allocation7 + $0x2c4] sm:$0xf]  ;;  %v2521_v1 = vor.u32 %v3370_v54, %v2518_v55 }
  0x5c   :  { %v3444_v17 = vld [vmem:[#allocation7 + $0x40c] sm:$0xf0]  ;;  %v2932_v18 = vld [vmem:[#allocation7 + $0x500] sm:$0xf]  ;;  %v3205_v27 = vor.u32 %v3544_v13, %v3204_v12  ;;  %1828 = vmatpush.bf16.msra.mxu1 %v2949_v21  ;;  %v2646_v59 = vld [vmem:[#allocation7 + $0x2d0] sm:$0xf0] }
  0x5d   :  { %v3476_v19 = vld [vmem:[#allocation7 + $0x50c] sm:$0xf0]  ;;  %v3060_v22 = vld [vmem:[#allocation7 + $0x600] sm:$0xf]  ;;  %v2805_v37 = vor.u32 %v3444_v17, %v2804_v16  ;;  %1842 = vmatpush.bf16.msra.mxu2 %v3077_v26  ;;  %v3434_v60 = vld [vmem:[#allocation7 + $0x3c4] sm:$0xf]  ;;  %v2649_v4 = vor.u32 %v3402_v56, %v2646_v59 }
  0x5e   :  { %v3508_v23 = vld [vmem:[#allocation7 + $0x60c] sm:$0xf0]  ;;  %v3188_v24 = vld [vmem:[#allocation7 + $0x700] sm:$0xf]  ;;  %v2933_v38 = vor.u32 %v3476_v19, %v2932_v18  ;;  %1856 = vmatpush.bf16.msra.mxu3 %v3205_v27  ;;  %v2774_v61 = vld [vmem:[#allocation7 + $0x3d0] sm:$0xf0] }
  0x5f   :  { %v3540_v25 = vld [vmem:[#allocation7 + $0x70c] sm:$0xf0]  ;;  %v111_v40 = vld [vmem:[#allocation3 + $0x30] sm:$0xff]  ;;  %v3061_v42 = vor.u32 %v3508_v23, %v3060_v22  ;;  %1815 = vmatpush.bf16.msra.mxu0 %v2805_v37  ;;  %v2374_v3 = vld [vmem:[#allocation7 + $0xb0] sm:$0xf0]  ;;  %v2777_v5 = vor.u32 %v3434_v60, %v2774_v61 }
  0x60   :  { %v109_v36 = vld [vmem:[#allocation3 + $0x20] sm:$0xff]  ;;  %v119_v41 = vld [vmem:[#allocation3 + $0x70] sm:$0xff]  ;;  %v3189_v43 = vor.u32 %v3540_v25, %v3188_v24  ;;  %1829 = vmatpush.bf16.msra.mxu1 %v2933_v38 }
  0x61   :  { %v117_v39 = vld [vmem:[#allocation3 + $0x60] sm:$0xff]  ;;  %v3799_v58 = vpack.c.bf16 %v119_v41, %v111_v40  ;;  %1843 = vmatpush.bf16.msra.mxu2 %v3061_v42  ;;  %v3334_v2 = vld [vmem:[#allocation7 + $0xa4] sm:$0xf] }
  0x62   :  { %v3797_v57 = vpack.c.bf16 %v117_v39, %v109_v36  ;;  %1857 = vmatpush.bf16.msra.mxu3 %v3189_v43  ;;  %v3366_v6 = vld [vmem:[#allocation7 + $0x1a4] sm:$0xf]  ;;  %v2502_v7 = vld [vmem:[#allocation7 + $0x1b0] sm:$0xf0]  ;;  %v2377_v16 = vor.u32 %v3334_v2, %v2374_v3 }
  0x63   :  { %1864 = vmatpush.bf16.msrb.mxu0 %v2409_v47  ;;  %v3398_v8 = vld [vmem:[#allocation7 + $0x2a4] sm:$0xf]  ;;  %v2630_v11 = vld [vmem:[#allocation7 + $0x2b0] sm:$0xf0]  ;;  %1830 = vmatmul.bf16.vlgmr.msra.gmra.mxu1 %v3801_v62  ;;  %v2505_v17 = vor.u32 %v3366_v6, %v2502_v7 }
  0x64   :  { %1878 = vmatpush.bf16.msrb.mxu1 %v2537_v48  ;;  %1816 = vmatmul.bf16.vlgmr.msra.gmra.mxu0 %v3797_v57  ;;  %v3430_v12 = vld [vmem:[#allocation7 + $0x3a4] sm:$0xf]  ;;  %v2758_v13 = vld [vmem:[#allocation7 + $0x3b0] sm:$0xf0]  ;;  %v2633_v20 = vor.u32 %v3398_v8, %v2630_v11 }
  0x65   :  { %1892 = vmatpush.bf16.msrb.mxu2 %v2665_v52  ;;  %1858 = vmatmul.bf16.vlgmr.msra.gmra.mxu3 %v3803_v63  ;;  %v3330_v18 = vld [vmem:[#allocation7 + $0x84] sm:$0xf]  ;;  %v2358_v19 = vld [vmem:[#allocation7 + $0x90] sm:$0xf0]  ;;  %v2761_v21 = vor.u32 %v3430_v12, %v2758_v13 }
  0x66   :  { %1906 = vmatpush.bf16.msrb.mxu3 %v2793_v53  ;;  %1844 = vmatmul.bf16.vlgmr.msra.gmra.mxu2 %v3799_v58  ;;  %v3362_v22 = vld [vmem:[#allocation7 + $0x184] sm:$0xf]  ;;  %v2486_v23 = vld [vmem:[#allocation7 + $0x190] sm:$0xf0]  ;;  %v2361_v28 = vor.u32 %v3330_v18, %v2358_v19 }
  0x67   :  { %1865 = vmatpush.bf16.msrb.mxu0 %v2393_v0  ;;  %v3394_v24 = vld [vmem:[#allocation7 + $0x284] sm:$0xf]  ;;  %v2614_v25 = vld [vmem:[#allocation7 + $0x290] sm:$0xf0]  ;;  %v2489_v29 = vor.u32 %v3362_v22, %v2486_v23 }
  0x68   :  { %1879 = vmatpush.bf16.msrb.mxu1 %v2521_v1  ;;  %v3426_v26 = vld [vmem:[#allocation7 + $0x384] sm:$0xf]  ;;  %v2742_v27 = vld [vmem:[#allocation7 + $0x390] sm:$0xf0]  ;;  %v2617_v32 = vor.u32 %v3394_v24, %v2614_v25 }
  0x69   :  { %1893 = vmatpush.bf16.msrb.mxu2 %v2649_v4  ;;  %v3326_v30 = vld [vmem:[#allocation7 + $0x64] sm:$0xf]  ;;  %v2342_v31 = vld [vmem:[#allocation7 + $0x70] sm:$0xf0]  ;;  %v2745_v33 = vor.u32 %v3426_v26, %v2742_v27 }
  0x6a   :  { %1907 = vmatpush.bf16.msrb.mxu3 %v2777_v5  ;;  %v3358_v34 = vld [vmem:[#allocation7 + $0x164] sm:$0xf]  ;;  %v2470_v35 = vld [vmem:[#allocation7 + $0x170] sm:$0xf0]  ;;  %v2345_v40 = vor.u32 %v3326_v30, %v2342_v31 }
  0x6b   :  { %1866 = vmatpush.bf16.msrb.mxu0 %v2377_v16  ;;  %v3390_v36 = vld [vmem:[#allocation7 + $0x264] sm:$0xf]  ;;  %v2598_v37 = vld [vmem:[#allocation7 + $0x270] sm:$0xf0]  ;;  %v2473_v41 = vor.u32 %v3358_v34, %v2470_v35 }
  0x6c   :  { %1880 = vmatpush.bf16.msrb.mxu1 %v2505_v17  ;;  %v3422_v38 = vld [vmem:[#allocation7 + $0x364] sm:$0xf]  ;;  %v2726_v39 = vld [vmem:[#allocation7 + $0x370] sm:$0xf0]  ;;  %v2601_v44 = vor.u32 %v3390_v36, %v2598_v37 }
  0x6d   :  { %1894 = vmatpush.bf16.msrb.mxu2 %v2633_v20  ;;  %v3322_v42 = vld [vmem:[#allocation7 + $0x44] sm:$0xf]  ;;  %v2326_v43 = vld [vmem:[#allocation7 + $0x50] sm:$0xf0]  ;;  %v2729_v45 = vor.u32 %v3422_v38, %v2726_v39 }
  0x6e   :  { %1908 = vmatpush.bf16.msrb.mxu3 %v2761_v21  ;;  %v3354_v46 = vld [vmem:[#allocation7 + $0x144] sm:$0xf]  ;;  %v2454_v47 = vld [vmem:[#allocation7 + $0x150] sm:$0xf0]  ;;  %v2329_v52 = vor.u32 %v3322_v42, %v2326_v43 }
  0x6f   :  { %1867 = vmatpush.bf16.msrb.mxu0 %v2361_v28  ;;  %v3386_v48 = vld [vmem:[#allocation7 + $0x244] sm:$0xf]  ;;  %v2582_v49 = vld [vmem:[#allocation7 + $0x250] sm:$0xf0]  ;;  %v2457_v53 = vor.u32 %v3354_v46, %v2454_v47 }
  0x70   :  { %1881 = vmatpush.bf16.msrb.mxu1 %v2489_v29  ;;  %v3418_v50 = vld [vmem:[#allocation7 + $0x344] sm:$0xf]  ;;  %v2710_v51 = vld [vmem:[#allocation7 + $0x350] sm:$0xf0]  ;;  %v2585_v56 = vor.u32 %v3386_v48, %v2582_v49 }
  0x71   :  { %1895 = vmatpush.bf16.msrb.mxu2 %v2617_v32  ;;  %v3318_v54 = vld [vmem:[#allocation7 + $0x24] sm:$0xf]  ;;  %v2310_v55 = vld [vmem:[#allocation7 + $0x30] sm:$0xf0]  ;;  %v2713_v59 = vor.u32 %v3418_v50, %v2710_v51 }
  0x72   :  { %1909 = vmatpush.bf16.msrb.mxu3 %v2745_v33  ;;  %v3350_v60 = vld [vmem:[#allocation7 + $0x124] sm:$0xf]  ;;  %v2438_v61 = vld [vmem:[#allocation7 + $0x130] sm:$0xf0]  ;;  %v2313_v5 = vor.u32 %v3318_v54, %v2310_v55 }
  0x73   :  { %1868 = vmatpush.bf16.msrb.mxu0 %v2345_v40  ;;  %v3382_v0 = vld [vmem:[#allocation7 + $0x224] sm:$0xf]  ;;  %v2566_v1 = vld [vmem:[#allocation7 + $0x230] sm:$0xf0]  ;;  %v2441_v6 = vor.u32 %v3350_v60, %v2438_v61 }
  0x74   :  { %1882 = vmatpush.bf16.msrb.mxu1 %v2473_v41  ;;  %v3414_v2 = vld [vmem:[#allocation7 + $0x324] sm:$0xf]  ;;  %v2694_v3 = vld [vmem:[#allocation7 + $0x330] sm:$0xf0]  ;;  %v2569_v12 = vor.u32 %v3382_v0, %v2566_v1 }
  0x75   :  { %1896 = vmatpush.bf16.msrb.mxu2 %v2601_v44  ;;  %v3314_v4 = vld [vmem:[#allocation7 + $0x4] sm:$0xf]  ;;  %v2294_v7 = vld [vmem:[#allocation7 + $0x10] sm:$0xf0]  ;;  %v2697_v13 = vor.u32 %v3414_v2, %v2694_v3 }
  0x76   :  { %1910 = vmatpush.bf16.msrb.mxu3 %v2729_v45  ;;  %v3346_v8 = vld [vmem:[#allocation7 + $0x104] sm:$0xf]  ;;  %v2422_v11 = vld [vmem:[#allocation7 + $0x110] sm:$0xf0]  ;;  %v2297_v25 = vor.u32 %v3314_v4, %v2294_v7 }
  0x77   :  { %1869 = vmatpush.bf16.msrb.mxu0 %v2329_v52  ;;  %v3378_v16 = vld [vmem:[#allocation7 + $0x204] sm:$0xf]  ;;  %v2550_v17 = vld [vmem:[#allocation7 + $0x210] sm:$0xf0]  ;;  %v2425_v26 = vor.u32 %v3346_v8, %v2422_v11 }
  0x78   :  { %1883 = vmatpush.bf16.msrb.mxu1 %v2457_v53  ;;  %v3410_v18 = vld [vmem:[#allocation7 + $0x304] sm:$0xf]  ;;  %v2678_v19 = vld [vmem:[#allocation7 + $0x310] sm:$0xf0]  ;;  %v2553_v30 = vor.u32 %v3378_v16, %v2550_v17 }
  0x79   :  { %1897 = vmatpush.bf16.msrb.mxu2 %v2585_v56  ;;  %v3470_v20 = vld [vmem:[#allocation7 + $0x4e4] sm:$0xf]  ;;  %v2918_v21 = vld [vmem:[#allocation7 + $0x4f0] sm:$0xf0]  ;;  %v2681_v31 = vor.u32 %v3410_v18, %v2678_v19 }
  0x7a   :  { %1911 = vmatpush.bf16.msrb.mxu3 %v2713_v59  ;;  %v3502_v22 = vld [vmem:[#allocation7 + $0x5e4] sm:$0xf]  ;;  %v3046_v23 = vld [vmem:[#allocation7 + $0x5f0] sm:$0xf0]  ;;  %v2921_v32 = vor.u32 %v3470_v20, %v2918_v21 }
  0x7b   :  { %v3534_v24 = vld [vmem:[#allocation7 + $0x6e4] sm:$0xf]  ;;  %1870 = vmatpush.bf16.msrb.mxu0 %v2313_v5  ;;  %v3174_v27 = vld [vmem:[#allocation7 + $0x6f0] sm:$0xf0]  ;;  %v3049_v33 = vor.u32 %v3502_v22, %v3046_v23 }
  0x7c   :  { %1884 = vmatpush.bf16.msrb.mxu1 %v2441_v6  ;;  %v3566_v28 = vld [vmem:[#allocation7 + $0x7e4] sm:$0xf]  ;;  %v3302_v29 = vld [vmem:[#allocation7 + $0x7f0] sm:$0xf0]  ;;  %v3177_v36 = vor.u32 %v3534_v24, %v3174_v27 }
  0x7d   :  { %1898 = vmatpush.bf16.msrb.mxu2 %v2569_v12  ;;  %v3466_v34 = vld [vmem:[#allocation7 + $0x4c4] sm:$0xf]  ;;  %v2902_v35 = vld [vmem:[#allocation7 + $0x4d0] sm:$0xf0]  ;;  %v3305_v37 = vor.u32 %v3566_v28, %v3302_v29 }
  0x7e   :  { %1912 = vmatpush.bf16.msrb.mxu3 %v2697_v13  ;;  %v3498_v38 = vld [vmem:[#allocation7 + $0x5c4] sm:$0xf]  ;;  %v3030_v39 = vld [vmem:[#allocation7 + $0x5d0] sm:$0xf0]  ;;  %v2905_v44 = vor.u32 %v3466_v34, %v2902_v35 }
  0x7f   :  { %v3530_v40 = vld [vmem:[#allocation7 + $0x6c4] sm:$0xf]  ;;  %1871 = vmatpush.bf16.msrb.mxu0 %v2297_v25  ;;  %v3158_v41 = vld [vmem:[#allocation7 + $0x6d0] sm:$0xf0]  ;;  %v3033_v45 = vor.u32 %v3498_v38, %v3030_v39 }
  0x80   :  { %1885 = vmatpush.bf16.msrb.mxu1 %v2425_v26  ;;  %v3562_v42 = vld [vmem:[#allocation7 + $0x7c4] sm:$0xf]  ;;  %v3286_v43 = vld [vmem:[#allocation7 + $0x7d0] sm:$0xf0]  ;;  %v3161_v48 = vor.u32 %v3530_v40, %v3158_v41 }
  0x81   :  { %1899 = vmatpush.bf16.msrb.mxu2 %v2553_v30  ;;  %v3462_v46 = vld [vmem:[#allocation7 + $0x4a4] sm:$0xf]  ;;  %v2886_v47 = vld [vmem:[#allocation7 + $0x4b0] sm:$0xf0]  ;;  %v3289_v49 = vor.u32 %v3562_v42, %v3286_v43 }
  0x82   :  { %1913 = vmatpush.bf16.msrb.mxu3 %v2681_v31  ;;  %v3494_v50 = vld [vmem:[#allocation7 + $0x5a4] sm:$0xf]  ;;  %v3014_v51 = vld [vmem:[#allocation7 + $0x5b0] sm:$0xf0]  ;;  %1872 = vmatmul.bf16.vlgmr.msrb.gmra.mxu0 %v3785_v9  ;;  %v2889_v56 = vor.u32 %v3462_v46, %v2886_v47 }
  0x83   :  { %1920 = vmatpush.bf16.msra.mxu0 %v2921_v32  ;;  %v3526_v52 = vld [vmem:[#allocation7 + $0x6a4] sm:$0xf]  ;;  %v3142_v53 = vld [vmem:[#allocation7 + $0x6b0] sm:$0xf0]  ;;  %1886 = vmatmul.bf16.vlgmr.msrb.gmra.mxu1 %v3789_v14  ;;  %v3017_v59 = vor.u32 %v3494_v50, %v3014_v51 }
  0x84   :  { %1934 = vmatpush.bf16.msra.mxu1 %v3049_v33  ;;  %1900 = vmatmul.bf16.vlgmr.msrb.gmra.mxu2 %v3787_v10  ;;  %v3558_v54 = vld [vmem:[#allocation7 + $0x7a4] sm:$0xf]  ;;  %v3270_v55 = vld [vmem:[#allocation7 + $0x7b0] sm:$0xf0]  ;;  %v3145_v1 = vor.u32 %v3526_v52, %v3142_v53 }
  0x85   :  { %1948 = vmatpush.bf16.msra.mxu2 %v3177_v36  ;;  %1914 = vmatmul.bf16.vlgmr.msrb.gmra.mxu3 %v3791_v15  ;;  %v3458_v60 = vld [vmem:[#allocation7 + $0x484] sm:$0xf]  ;;  %v2870_v61 = vld [vmem:[#allocation7 + $0x490] sm:$0xf0]  ;;  %v3273_v2 = vor.u32 %v3558_v54, %v3270_v55 }
  0x86   :  { %1962 = vmatpush.bf16.msra.mxu3 %v3305_v37  ;;  %v3490_v0 = vld [vmem:[#allocation7 + $0x584] sm:$0xf]  ;;  %v2998_v3 = vld [vmem:[#allocation7 + $0x590] sm:$0xf0]  ;;  %v2873_v8 = vor.u32 %v3458_v60, %v2870_v61 }
  0x87   :  { %1921 = vmatpush.bf16.msra.mxu0 %v2905_v44  ;;  %v3522_v4 = vld [vmem:[#allocation7 + $0x684] sm:$0xf]  ;;  %v3126_v5 = vld [vmem:[#allocation7 + $0x690] sm:$0xf0]  ;;  %v3001_v11 = vor.u32 %v3490_v0, %v2998_v3  ;;  %v2412_v0 = vld [vmem:[#allocation7 + $0xe8] sm:$0xf] }
  0x88   :  { %1935 = vmatpush.bf16.msra.mxu1 %v3033_v45  ;;  %v3554_v6 = vld [vmem:[#allocation7 + $0x784] sm:$0xf]  ;;  %v3254_v7 = vld [vmem:[#allocation7 + $0x790] sm:$0xf0]  ;;  %v3129_v16 = vor.u32 %v3522_v4, %v3126_v5  ;;  %v3377_v3 = vld [vmem:[#allocation7 + $0x1f4] sm:$0xf0] }
  0x89   :  { %1949 = vmatpush.bf16.msra.mxu2 %v3161_v48  ;;  %v3454_v12 = vld [vmem:[#allocation7 + $0x464] sm:$0xf]  ;;  %v2854_v13 = vld [vmem:[#allocation7 + $0x470] sm:$0xf0]  ;;  %v3257_v17 = vor.u32 %v3554_v6, %v3254_v7  ;;  %v2668_v4 = vld [vmem:[#allocation7 + $0x2e8] sm:$0xf] }
  0x8a   :  { %1963 = vmatpush.bf16.msra.mxu3 %v3289_v49  ;;  %v3486_v18 = vld [vmem:[#allocation7 + $0x564] sm:$0xf]  ;;  %v2982_v19 = vld [vmem:[#allocation7 + $0x570] sm:$0xf0]  ;;  %v2857_v24 = vor.u32 %v3454_v12, %v2854_v13  ;;  %v3409_v7 = vld [vmem:[#allocation7 + $0x2f4] sm:$0xf0] }
  0x8b   :  { %1922 = vmatpush.bf16.msra.mxu0 %v2889_v56  ;;  %v3518_v20 = vld [vmem:[#allocation7 + $0x664] sm:$0xf]  ;;  %v3110_v21 = vld [vmem:[#allocation7 + $0x670] sm:$0xf0]  ;;  %v2985_v25 = vor.u32 %v3486_v18, %v2982_v19  ;;  %v2396_v18 = vld [vmem:[#allocation7 + $0xc8] sm:$0xf] }
  0x8c   :  { %1936 = vmatpush.bf16.msra.mxu1 %v3017_v59  ;;  %v3550_v22 = vld [vmem:[#allocation7 + $0x764] sm:$0xf]  ;;  %v3238_v23 = vld [vmem:[#allocation7 + $0x770] sm:$0xf0]  ;;  %v3113_v28 = vor.u32 %v3518_v20, %v3110_v21  ;;  %v3341_v19 = vld [vmem:[#allocation7 + $0xd4] sm:$0xf0]  ;;  %v2669_v20 = vor.u32 %v3409_v7, %v2668_v4 }
  0x8d   :  { %1950 = vmatpush.bf16.msra.mxu2 %v3145_v1  ;;  %v3450_v26 = vld [vmem:[#allocation7 + $0x444] sm:$0xf]  ;;  %v2838_v27 = vld [vmem:[#allocation7 + $0x450] sm:$0xf0]  ;;  %v3241_v29 = vor.u32 %v3550_v22, %v3238_v23  ;;  %v3345_v1 = vld [vmem:[#allocation7 + $0xf4] sm:$0xf0] }
  0x8e   :  { %1964 = vmatpush.bf16.msra.mxu3 %v3273_v2  ;;  %v3482_v30 = vld [vmem:[#allocation7 + $0x544] sm:$0xf]  ;;  %v2966_v31 = vld [vmem:[#allocation7 + $0x550] sm:$0xf0]  ;;  %v2841_v36 = vor.u32 %v3450_v26, %v2838_v27  ;;  %v2540_v2 = vld [vmem:[#allocation7 + $0x1e8] sm:$0xf] }
  0x8f   :  { %1923 = vmatpush.bf16.msra.mxu0 %v2873_v8  ;;  %v3514_v32 = vld [vmem:[#allocation7 + $0x644] sm:$0xf]  ;;  %v3094_v33 = vld [vmem:[#allocation7 + $0x650] sm:$0xf0]  ;;  %v2969_v37 = vor.u32 %v3482_v30, %v2966_v31  ;;  %v2796_v8 = vld [vmem:[#allocation7 + $0x3e8] sm:$0xf] }
  0x90   :  { %1937 = vmatpush.bf16.msra.mxu1 %v3001_v11  ;;  %v3546_v34 = vld [vmem:[#allocation7 + $0x744] sm:$0xf]  ;;  %v3222_v35 = vld [vmem:[#allocation7 + $0x750] sm:$0xf0]  ;;  %v3097_v40 = vor.u32 %v3514_v32, %v3094_v33  ;;  %v3441_v11 = vld [vmem:[#allocation7 + $0x3f4] sm:$0xf0] }
  0x91   :  { %1951 = vmatpush.bf16.msra.mxu2 %v3129_v16  ;;  %v3446_v38 = vld [vmem:[#allocation7 + $0x424] sm:$0xf]  ;;  %v2822_v39 = vld [vmem:[#allocation7 + $0x430] sm:$0xf0]  ;;  %v3225_v41 = vor.u32 %v3546_v34, %v3222_v35  ;;  %v2413_v16 = vor.u32 %v3345_v1, %v2412_v0  ;;  %v2797_v21 = vor.u32 %v3441_v11, %v2796_v8  ;;  %v2524_v22 = vld [vmem:[#allocation7 + $0x1c8] sm:$0xf] }
  0x92   :  { %1965 = vmatpush.bf16.msra.mxu3 %v3257_v17  ;;  %v3478_v42 = vld [vmem:[#allocation7 + $0x524] sm:$0xf]  ;;  %v2950_v43 = vld [vmem:[#allocation7 + $0x530] sm:$0xf0]  ;;  %v2825_v49 = vor.u32 %v3446_v38, %v2822_v39  ;;  %v2541_v17 = vor.u32 %v3377_v3, %v2540_v2  ;;  %v3373_v23 = vld [vmem:[#allocation7 + $0x1d4] sm:$0xf0] }
  0x93   :  { %1924 = vmatpush.bf16.msra.mxu0 %v2857_v24  ;;  %v3510_v44 = vld [vmem:[#allocation7 + $0x624] sm:$0xf]  ;;  %v3078_v45 = vld [vmem:[#allocation7 + $0x630] sm:$0xf0]  ;;  %v2953_v50 = vor.u32 %v3478_v42, %v2950_v43  ;;  %v2652_v24 = vld [vmem:[#allocation7 + $0x2c8] sm:$0xf] }
  0x94   :  { %1938 = vmatpush.bf16.msra.mxu1 %v2985_v25  ;;  %v3542_v46 = vld [vmem:[#allocation7 + $0x724] sm:$0xf]  ;;  %v3206_v47 = vld [vmem:[#allocation7 + $0x730] sm:$0xf0]  ;;  %v3081_v54 = vor.u32 %v3510_v44, %v3078_v45  ;;  %v3405_v25 = vld [vmem:[#allocation7 + $0x2d4] sm:$0xf0] }
  0x95   :  { %1952 = vmatpush.bf16.msra.mxu2 %v3113_v28  ;;  %v3442_v48 = vld [vmem:[#allocation7 + $0x404] sm:$0xf]  ;;  %v2806_v51 = vld [vmem:[#allocation7 + $0x410] sm:$0xf0]  ;;  %v3209_v55 = vor.u32 %v3542_v46, %v3206_v47  ;;  %v2780_v26 = vld [vmem:[#allocation7 + $0x3c8] sm:$0xf]  ;;  %v2397_v28 = vor.u32 %v3341_v19, %v2396_v18  ;;  %v2653_v32 = vor.u32 %v3405_v25, %v2652_v24 }
  0x96   :  { %1966 = vmatpush.bf16.msra.mxu3 %v3241_v29  ;;  %v3474_v52 = vld [vmem:[#allocation7 + $0x504] sm:$0xf]  ;;  %v2934_v53 = vld [vmem:[#allocation7 + $0x510] sm:$0xf0]  ;;  %v2809_v5 = vor.u32 %v3442_v48, %v2806_v51  ;;  %v3437_v27 = vld [vmem:[#allocation7 + $0x3d4] sm:$0xf0]  ;;  %v2525_v29 = vor.u32 %v3373_v23, %v2524_v22 }
  0x97   :  { %1925 = vmatpush.bf16.msra.mxu0 %v2841_v36  ;;  %v3506_v56 = vld [vmem:[#allocation7 + $0x604] sm:$0xf]  ;;  %v3062_v59 = vld [vmem:[#allocation7 + $0x610] sm:$0xf0]  ;;  %v2937_v6 = vor.u32 %v3474_v52, %v2934_v53  ;;  %v2380_v30 = vld [vmem:[#allocation7 + $0xa8] sm:$0xf]  ;;  %v2781_v33 = vor.u32 %v3437_v27, %v2780_v26 }
  0x98   :  { %1939 = vmatpush.bf16.msra.mxu1 %v2969_v37  ;;  %v3538_v60 = vld [vmem:[#allocation7 + $0x704] sm:$0xf]  ;;  %v3190_v61 = vld [vmem:[#allocation7 + $0x710] sm:$0xf0]  ;;  %v3065_v12 = vor.u32 %v3506_v56, %v3062_v59  ;;  %v3337_v31 = vld [vmem:[#allocation7 + $0xb4] sm:$0xf0] }
  0x99   :  { %1953 = vmatpush.bf16.msra.mxu2 %v3097_v40  ;;  %v3193_v13 = vor.u32 %v3538_v60, %v3190_v61  ;;  %v2508_v34 = vld [vmem:[#allocation7 + $0x1a8] sm:$0xf]  ;;  %v3369_v35 = vld [vmem:[#allocation7 + $0x1b4] sm:$0xf0]  ;;  %v2381_v40 = vor.u32 %v3337_v31, %v2380_v30 }
  0x9a   :  { %1967 = vmatpush.bf16.msra.mxu3 %v3225_v41  ;;  %v2636_v36 = vld [vmem:[#allocation7 + $0x2a8] sm:$0xf]  ;;  %v3401_v37 = vld [vmem:[#allocation7 + $0x2b4] sm:$0xf0]  ;;  %v2509_v41 = vor.u32 %v3369_v35, %v2508_v34 }
  0x9b   :  { %1926 = vmatpush.bf16.msra.mxu0 %v2825_v49  ;;  %v2764_v38 = vld [vmem:[#allocation7 + $0x3a8] sm:$0xf]  ;;  %v3433_v39 = vld [vmem:[#allocation7 + $0x3b4] sm:$0xf0]  ;;  %v2637_v44 = vor.u32 %v3401_v37, %v2636_v36 }
  0x9c   :  { %1940 = vmatpush.bf16.msra.mxu1 %v2953_v50  ;;  %v2364_v42 = vld [vmem:[#allocation7 + $0x88] sm:$0xf]  ;;  %v3333_v43 = vld [vmem:[#allocation7 + $0x94] sm:$0xf0]  ;;  %v2765_v45 = vor.u32 %v3433_v39, %v2764_v38 }
  0x9d   :  { %1954 = vmatpush.bf16.msra.mxu2 %v3081_v54  ;;  %v2492_v46 = vld [vmem:[#allocation7 + $0x188] sm:$0xf]  ;;  %v3365_v47 = vld [vmem:[#allocation7 + $0x194] sm:$0xf0]  ;;  %v2365_v52 = vor.u32 %v3333_v43, %v2364_v42 }
  0x9e   :  { %1968 = vmatpush.bf16.msra.mxu3 %v3209_v55  ;;  %v2620_v48 = vld [vmem:[#allocation7 + $0x288] sm:$0xf]  ;;  %v3397_v49 = vld [vmem:[#allocation7 + $0x294] sm:$0xf0]  ;;  %v2493_v53 = vor.u32 %v3365_v47, %v2492_v46 }
  0x9f   :  { %1927 = vmatpush.bf16.msra.mxu0 %v2809_v5  ;;  %v2748_v50 = vld [vmem:[#allocation7 + $0x388] sm:$0xf]  ;;  %v3429_v51 = vld [vmem:[#allocation7 + $0x394] sm:$0xf0]  ;;  %v2621_v56 = vor.u32 %v3397_v49, %v2620_v48 }
  0xa0   :  { %1941 = vmatpush.bf16.msra.mxu1 %v2937_v6  ;;  %v2348_v54 = vld [vmem:[#allocation7 + $0x68] sm:$0xf]  ;;  %v3329_v55 = vld [vmem:[#allocation7 + $0x74] sm:$0xf0]  ;;  %v2749_v59 = vor.u32 %v3429_v51, %v2748_v50 }
  0xa1   :  { %1955 = vmatpush.bf16.msra.mxu2 %v3065_v12  ;;  %v2476_v60 = vld [vmem:[#allocation7 + $0x168] sm:$0xf]  ;;  %v3361_v61 = vld [vmem:[#allocation7 + $0x174] sm:$0xf0]  ;;  %v2349_v4 = vor.u32 %v3329_v55, %v2348_v54 }
  0xa2   :  { %1969 = vmatpush.bf16.msra.mxu3 %v3193_v13  ;;  %1928 = vmatmul.bf16.vlgmr.msra.gmra.mxu0 %v3797_v57  ;;  %v2604_v0 = vld [vmem:[#allocation7 + $0x268] sm:$0xf]  ;;  %v3393_v1 = vld [vmem:[#allocation7 + $0x274] sm:$0xf0]  ;;  %v2477_v5 = vor.u32 %v3361_v61, %v2476_v60 }
  0xa3   :  { %1976 = vmatpush.bf16.msrb.mxu0 %v2413_v16  ;;  %1942 = vmatmul.bf16.vlgmr.msra.gmra.mxu1 %v3801_v62  ;;  %v2732_v2 = vld [vmem:[#allocation7 + $0x368] sm:$0xf]  ;;  %v3425_v3 = vld [vmem:[#allocation7 + $0x374] sm:$0xf0]  ;;  %v2605_v8 = vor.u32 %v3393_v1, %v2604_v0 }
  0xa4   :  { %1990 = vmatpush.bf16.msrb.mxu1 %v2541_v17  ;;  %1956 = vmatmul.bf16.vlgmr.msra.gmra.mxu2 %v3799_v58  ;;  %v2332_v6 = vld [vmem:[#allocation7 + $0x48] sm:$0xf]  ;;  %v3325_v7 = vld [vmem:[#allocation7 + $0x54] sm:$0xf0]  ;;  %v2733_v11 = vor.u32 %v3425_v3, %v2732_v2 }
  0xa5   :  { %2004 = vmatpush.bf16.msrb.mxu2 %v2669_v20  ;;  %1970 = vmatmul.bf16.vlgmr.msra.gmra.mxu3 %v3803_v63  ;;  %v2460_v12 = vld [vmem:[#allocation7 + $0x148] sm:$0xf]  ;;  %v3357_v13 = vld [vmem:[#allocation7 + $0x154] sm:$0xf0]  ;;  %v2333_v20 = vor.u32 %v3325_v7, %v2332_v6 }
  0xa6   :  { %2018 = vmatpush.bf16.msrb.mxu3 %v2797_v21  ;;  %v2588_v16 = vld [vmem:[#allocation7 + $0x248] sm:$0xf]  ;;  %v3389_v17 = vld [vmem:[#allocation7 + $0x254] sm:$0xf0]  ;;  %v2461_v21 = vor.u32 %v3357_v13, %v2460_v12 }
  0xa7   :  { %1977 = vmatpush.bf16.msrb.mxu0 %v2397_v28  ;;  %v2716_v18 = vld [vmem:[#allocation7 + $0x348] sm:$0xf]  ;;  %v3421_v19 = vld [vmem:[#allocation7 + $0x354] sm:$0xf0]  ;;  %v2589_v24 = vor.u32 %v3389_v17, %v2588_v16 }
  0xa8   :  { %1991 = vmatpush.bf16.msrb.mxu1 %v2525_v29  ;;  %v2316_v22 = vld [vmem:[#allocation7 + $0x28] sm:$0xf]  ;;  %v3321_v23 = vld [vmem:[#allocation7 + $0x34] sm:$0xf0]  ;;  %v2717_v25 = vor.u32 %v3421_v19, %v2716_v18 }
  0xa9   :  { %2005 = vmatpush.bf16.msrb.mxu2 %v2653_v32  ;;  %v2444_v27 = vld [vmem:[#allocation7 + $0x128] sm:$0xf]  ;;  %v3353_v28 = vld [vmem:[#allocation7 + $0x134] sm:$0xf0]  ;;  %v2317_v35 = vor.u32 %v3321_v23, %v2316_v22 }
  0xaa   :  { %2019 = vmatpush.bf16.msrb.mxu3 %v2781_v33  ;;  %v2572_v29 = vld [vmem:[#allocation7 + $0x228] sm:$0xf]  ;;  %v3385_v30 = vld [vmem:[#allocation7 + $0x234] sm:$0xf0]  ;;  %v2445_v36 = vor.u32 %v3353_v28, %v2444_v27 }
  0xab   :  { %1978 = vmatpush.bf16.msrb.mxu0 %v2381_v40  ;;  %v2700_v31 = vld [vmem:[#allocation7 + $0x328] sm:$0xf]  ;;  %v3417_v32 = vld [vmem:[#allocation7 + $0x334] sm:$0xf0]  ;;  %v2573_v40 = vor.u32 %v3385_v30, %v2572_v29 }
  0xac   :  { %1992 = vmatpush.bf16.msrb.mxu1 %v2509_v41  ;;  %v2300_v34 = vld [vmem:[#allocation7 + $0x8] sm:$0xf]  ;;  %v3317_v37 = vld [vmem:[#allocation7 + $0x14] sm:$0xf0]  ;;  %v2701_v41 = vor.u32 %v3417_v32, %v2700_v31 }
  0xad   :  { %2006 = vmatpush.bf16.msrb.mxu2 %v2637_v44  ;;  %v3817_v26 = vpop.f32.mrf.mxu0  ;;  %v2428_v38 = vld [vmem:[#allocation7 + $0x108] sm:$0xf]  ;;  %v3349_v39 = vld [vmem:[#allocation7 + $0x114] sm:$0xf0] }
  0xae   :  { %2020 = vmatpush.bf16.msrb.mxu3 %v2765_v45  ;;  %v3819_v33 = vpop.f32.mrf.mxu1  ;;  %v2556_v42 = vld [vmem:[#allocation7 + $0x208] sm:$0xf]  ;;  %v3381_v43 = vld [vmem:[#allocation7 + $0x214] sm:$0xf0] }
  0xaf   :  { %1979 = vmatpush.bf16.msrb.mxu0 %v2365_v52  ;;  %v2684_v44 = vld [vmem:[#allocation7 + $0x308] sm:$0xf]  ;;  %v3413_v45 = vld [vmem:[#allocation7 + $0x314] sm:$0xf0]  ;;  %v2301_v52 = vor.u32 %v3317_v37, %v2300_v34  ;;  %v2557_v60 = vor.u32 %v3381_v43, %v2556_v42 }
  0xb0   :  { %1993 = vmatpush.bf16.msrb.mxu1 %v2493_v53  ;;  %v2924_v46 = vld [vmem:[#allocation7 + $0x4e8] sm:$0xf]  ;;  %v3473_v47 = vld [vmem:[#allocation7 + $0x4f4] sm:$0xf0]  ;;  %v2429_v53 = vor.u32 %v3349_v39, %v2428_v38  ;;  %v2685_v61 = vor.u32 %v3413_v45, %v2684_v44 }
  0xb1   :  { %2007 = vmatpush.bf16.msrb.mxu2 %v2621_v56  ;;  %v3052_v48 = vld [vmem:[#allocation7 + $0x5e8] sm:$0xf]  ;;  %v3505_v49 = vld [vmem:[#allocation7 + $0x5f4] sm:$0xf0]  ;;  %v2925_v0 = vor.u32 %v3473_v47, %v2924_v46 }
  0xb2   :  { %2021 = vmatpush.bf16.msrb.mxu3 %v2749_v59  ;;  %v3180_v50 = vld [vmem:[#allocation7 + $0x6e8] sm:$0xf]  ;;  %v3537_v54 = vld [vmem:[#allocation7 + $0x6f4] sm:$0xf0]  ;;  %v3053_v1 = vor.u32 %v3505_v49, %v3052_v48 }
  0xb3   :  { %1980 = vmatpush.bf16.msrb.mxu0 %v2349_v4  ;;  %v3821_v51 = vpop.f32.mrf.mxu2  ;;  %v3308_v55 = vld [vmem:[#allocation7 + $0x7e8] sm:$0xf]  ;;  %v3569_v56 = vld [vmem:[#allocation7 + $0x7f4] sm:$0xf0]  ;;  %v3181_v4 = vor.u32 %v3537_v54, %v3180_v50 }
  0xb4   :  { %1994 = vmatpush.bf16.msrb.mxu1 %v2477_v5  ;;  %v3823_v59 = vpop.f32.mrf.mxu3  ;;  %v2908_v2 = vld [vmem:[#allocation7 + $0x4c8] sm:$0xf]  ;;  %v3469_v3 = vld [vmem:[#allocation7 + $0x4d4] sm:$0xf0]  ;;  %v3309_v5 = vor.u32 %v3569_v56, %v3308_v55 }
  0xb5   :  { %2008 = vmatpush.bf16.msrb.mxu2 %v2605_v8  ;;  %v3825_v6 = vpop.f32.mrf.mxu0  ;;  %v3036_v7 = vld [vmem:[#allocation7 + $0x5c8] sm:$0xf]  ;;  %v3501_v8 = vld [vmem:[#allocation7 + $0x5d4] sm:$0xf0]  ;;  %v2909_v18 = vor.u32 %v3469_v3, %v2908_v2 }
  0xb6   :  { %2022 = vmatpush.bf16.msrb.mxu3 %v2733_v11  ;;  %v3164_v11 = vld [vmem:[#allocation7 + $0x6c8] sm:$0xf]  ;;  %v3533_v12 = vld [vmem:[#allocation7 + $0x6d4] sm:$0xf0]  ;;  %v3827_v17 = vpop.f32.mrf.mxu1  ;;  %v3037_v19 = vor.u32 %v3501_v8, %v3036_v7 }
  0xb7   :  { %1981 = vmatpush.bf16.msrb.mxu0 %v2333_v20  ;;  %v3292_v13 = vld [vmem:[#allocation7 + $0x7c8] sm:$0xf]  ;;  %v3565_v16 = vld [vmem:[#allocation7 + $0x7d4] sm:$0xf0]  ;;  %v3165_v22 = vor.u32 %v3533_v12, %v3164_v11 }
  0xb8   :  { %1995 = vmatpush.bf16.msrb.mxu1 %v2461_v21  ;;  %v2892_v20 = vld [vmem:[#allocation7 + $0x4a8] sm:$0xf]  ;;  %v3465_v21 = vld [vmem:[#allocation7 + $0x4b4] sm:$0xf0]  ;;  %v3293_v23 = vor.u32 %v3565_v16, %v3292_v13 }
  0xb9   :  { %2009 = vmatpush.bf16.msrb.mxu2 %v2589_v24  ;;  %v3020_v24 = vld [vmem:[#allocation7 + $0x5a8] sm:$0xf]  ;;  %v3529_v28 = vld [vmem:[#allocation7 + $0x6b4] sm:$0xf0]  ;;  %v2893_v32 = vor.u32 %v3465_v21, %v2892_v20 }
  0xba   :  { %2023 = vmatpush.bf16.msrb.mxu3 %v2717_v25  ;;  %v3497_v25 = vld [vmem:[#allocation7 + $0x5b4] sm:$0xf0]  ;;  %v3148_v27 = vld [vmem:[#allocation7 + $0x6a8] sm:$0xf] }
  0xbb   :  { %1982 = vmatpush.bf16.msrb.mxu0 %v2317_v35  ;;  %v3276_v29 = vld [vmem:[#allocation7 + $0x7a8] sm:$0xf]  ;;  %v3561_v30 = vld [vmem:[#allocation7 + $0x7b4] sm:$0xf0]  ;;  %v3833_v31 = vpop.f32.mrf.mxu2  ;;  %v3021_v34 = vor.u32 %v3497_v25, %v3020_v24  ;;  %v3149_v38 = vor.u32 %v3529_v28, %v3148_v27 }
  0xbc   :  { %1996 = vmatpush.bf16.msrb.mxu1 %v2445_v36  ;;  %v3835_v35 = vpop.f32.mrf.mxu3  ;;  %v2876_v36 = vld [vmem:[#allocation7 + $0x488] sm:$0xf]  ;;  %v3461_v37 = vld [vmem:[#allocation7 + $0x494] sm:$0xf0]  ;;  %v3277_v39 = vor.u32 %v3561_v30, %v3276_v29 }
  0xbd   :  { %2010 = vmatpush.bf16.msrb.mxu2 %v2573_v40  ;;  %v3004_v40 = vld [vmem:[#allocation7 + $0x588] sm:$0xf]  ;;  %v3525_v43 = vld [vmem:[#allocation7 + $0x694] sm:$0xf0]  ;;  %v2877_v48 = vor.u32 %v3461_v37, %v2876_v36 }
  0xbe   :  { %2024 = vmatpush.bf16.msrb.mxu3 %v2701_v41  ;;  %v3493_v41 = vld [vmem:[#allocation7 + $0x594] sm:$0xf0]  ;;  %v3132_v42 = vld [vmem:[#allocation7 + $0x688] sm:$0xf]  ;;  %v1775_v50 = vpop.f32.mrf.mxu1 }
  0xbf   :  { %1983 = vmatpush.bf16.msrb.mxu0 %v2301_v52  ;;  %v3260_v44 = vld [vmem:[#allocation7 + $0x788] sm:$0xf]  ;;  %v3557_v45 = vld [vmem:[#allocation7 + $0x794] sm:$0xf0]  ;;  %v3005_v49 = vor.u32 %v3493_v41, %v3004_v40  ;;  %v3133_v54 = vor.u32 %v3525_v43, %v3132_v42 }
  0xc0   :  { %1997 = vmatpush.bf16.msrb.mxu1 %v2429_v53  ;;  %v2860_v52 = vld [vmem:[#allocation7 + $0x468] sm:$0xf]  ;;  %v3457_v53 = vld [vmem:[#allocation7 + $0x474] sm:$0xf0]  ;;  %v3261_v55 = vor.u32 %v3557_v45, %v3260_v44 }
  0xc1   :  { %2011 = vmatpush.bf16.msrb.mxu2 %v2557_v60  ;;  %v2988_v56 = vld [vmem:[#allocation7 + $0x568] sm:$0xf]  ;;  %v3489_v60 = vld [vmem:[#allocation7 + $0x574] sm:$0xf0] }
  0xc2   :  { %2025 = vmatpush.bf16.msrb.mxu3 %v2685_v61  ;;  %1984 = vmatmul.bf16.vlgmr.msrb.gmra.mxu0 %v3785_v9  ;;  %v3116_v61 = vld [vmem:[#allocation7 + $0x668] sm:$0xf]  ;;  %v3553_v3 = vld [vmem:[#allocation7 + $0x774] sm:$0xf0] }
  0xc3   :  { %2032 = vmatpush.bf16.msra.mxu0 %v2925_v0  ;;  %1998 = vmatmul.bf16.vlgmr.msrb.gmra.mxu1 %v3789_v14  ;;  %v1761_v46 = vpop.f32.mrf.mxu0  ;;  %v3244_v2 = vld [vmem:[#allocation7 + $0x768] sm:$0xf]  ;;  %v3453_v7 = vld [vmem:[#allocation7 + $0x454] sm:$0xf0] }
  0xc4   :  { %2046 = vmatpush.bf16.msra.mxu1 %v3053_v1  ;;  %2012 = vmatmul.bf16.vlgmr.msrb.gmra.mxu2 %v3787_v10  ;;  %v1762_v47 = vadd.f32 %v1761_v46, %v3817_v26  ;;  %v3521_v1 = vld [vmem:[#allocation7 + $0x674] sm:$0xf0]  ;;  %v2989_v26 = vor.u32 %v3489_v60, %v2988_v56  ;;  %v3245_v11 = vor.u32 %v3553_v3, %v3244_v2  ;;  %v2972_v13 = vld [vmem:[#allocation7 + $0x548] sm:$0xf]  ;;  %v2414_v2 = vld [vmem:[#allocation7 + $0xf8] sm:$0xf0] }
  0xc5   :  { %2060 = vmatpush.bf16.msra.mxu2 %v3181_v4  ;;  %2026 = vmatmul.bf16.vlgmr.msrb.gmra.mxu3 %v3791_v15  ;;  %v2861_v4 = vor.u32 %v3457_v53, %v2860_v52  ;;  %v3117_v8 = vor.u32 %v3521_v1, %v3116_v61  ;;  %v3485_v16 = vld [vmem:[#allocation7 + $0x554] sm:$0xf0]  ;;  %v3084_v40 = vld [vmem:[#allocation7 + $0x628] sm:$0xf]  ;;  %v3343_v1 = vld [vmem:[#allocation7 + $0xec] sm:$0xf] }
  0xc6   :  { %2074 = vmatpush.bf16.msra.mxu3 %v3309_v5  ;;  %v1776_v0 = vadd.f32 %v1775_v50, %v1762_v47  ;;  %v2844_v5 = vld [vmem:[#allocation7 + $0x448] sm:$0xf]  ;;  %v1803_v20 = vpop.f32.mrf.mxu3  ;;  %v3517_v21 = vld [vmem:[#allocation7 + $0x654] sm:$0xf0]  ;;  %v2973_v29 = vor.u32 %v3485_v16, %v2972_v13  ;;  %v1777_v30 = vpop.f32.mrf.mxu1  ;;  %v3375_v3 = vld [vmem:[#allocation7 + $0x1ec] sm:$0xf] }
  0xc7   :  { %2033 = vmatpush.bf16.msra.mxu0 %v2909_v18  ;;  %v3100_v18 = vld [vmem:[#allocation7 + $0x648] sm:$0xf]  ;;  %v2845_v25 = vor.u32 %v3453_v7, %v2844_v5  ;;  %v3513_v42 = vld [vmem:[#allocation7 + $0x634] sm:$0xf0]  ;;  %v2798_v13 = vld [vmem:[#allocation7 + $0x3f8] sm:$0xf0] }
  0xc8   :  { %2047 = vmatpush.bf16.msra.mxu1 %v3037_v19  ;;  %v1789_v12 = vpop.f32.mrf.mxu2  ;;  %v3101_v36 = vor.u32 %v3517_v21, %v3100_v18  ;;  %v3212_v43 = vld [vmem:[#allocation7 + $0x728] sm:$0xf]  ;;  %v3545_v44 = vld [vmem:[#allocation7 + $0x734] sm:$0xf0]  ;;  %v3085_v50 = vor.u32 %v3513_v42, %v3084_v40  ;;  %v3339_v21 = vld [vmem:[#allocation7 + $0xcc] sm:$0xf] }
  0xc9   :  { %2061 = vmatpush.bf16.msra.mxu2 %v3165_v22  ;;  %v1790_v19 = vadd.f32 %v1789_v12, %v1776_v0  ;;  %v3228_v22 = vld [vmem:[#allocation7 + $0x748] sm:$0xf]  ;;  %v3445_v47 = vld [vmem:[#allocation7 + $0x414] sm:$0xf0]  ;;  %v3213_v52 = vor.u32 %v3545_v44, %v3212_v43  ;;  %v3439_v12 = vld [vmem:[#allocation7 + $0x3ec] sm:$0xf] }
  0xca   :  { %2075 = vmatpush.bf16.msra.mxu3 %v3293_v23  ;;  %v3549_v23 = vld [vmem:[#allocation7 + $0x754] sm:$0xf0]  ;;  %v2812_v45 = vld [vmem:[#allocation7 + $0x408] sm:$0xf]  ;;  %v3367_v42 = vld [vmem:[#allocation7 + $0x1ac] sm:$0xf] }
  0xcb   :  { %2034 = vmatpush.bf16.msra.mxu0 %v2893_v32  ;;  %v1763_v24 = vpop.f32.mrf.mxu0  ;;  %v3839_v28 = vadd.f32 %v1803_v20, %v1790_v19  ;;  %v2828_v32 = vld [vmem:[#allocation7 + $0x428] sm:$0xf]  ;;  %v3229_v37 = vor.u32 %v3549_v23, %v3228_v22  ;;  %v3541_v0 = vld [vmem:[#allocation7 + $0x714] sm:$0xf0]  ;;  %v2813_v7 = vor.u32 %v3445_v47, %v2812_v45  ;;  %v2417_v19 = vor.u32 %v3343_v1, %v2414_v2  ;;  %v2398_v22 = vld [vmem:[#allocation7 + $0xd8] sm:$0xf0] }
  0xcc   :  { %2048 = vmatpush.bf16.msra.mxu1 %v3021_v34  ;;  %v1764_v27 = vadd.f32 %v1763_v24, %v3825_v6  ;;  %v3449_v34 = vld [vmem:[#allocation7 + $0x434] sm:$0xf0]  ;;  %v3196_v56 = vld [vmem:[#allocation7 + $0x708] sm:$0xf]  ;;  %v2801_v24 = vor.u32 %v3439_v12, %v2798_v13  ;;  %v2510_v43 = vld [vmem:[#allocation7 + $0x1b8] sm:$0xf0] }
  0xcd   :  { %2062 = vmatpush.bf16.msra.mxu2 %v3149_v38  ;;  %v2956_v38 = vld [vmem:[#allocation7 + $0x528] sm:$0xf]  ;;  %v2829_v6 = vor.u32 %v3449_v34, %v2828_v32  ;;  %v3197_v18 = vor.u32 %v3541_v0, %v3196_v56  ;;  %v3435_v32 = vld [vmem:[#allocation7 + $0x3cc] sm:$0xf]  ;;  %v2782_v34 = vld [vmem:[#allocation7 + $0x3d8] sm:$0xf0] }
  0xce   :  { %2076 = vmatpush.bf16.msra.mxu3 %v3277_v39  ;;  %v3481_v39 = vld [vmem:[#allocation7 + $0x534] sm:$0xf0]  ;;  %v1778_v41 = vadd.f32 %v1777_v30, %v1764_v27  ;;  %v1805_v61 = vpop.f32.mrf.mxu3  ;;  %v2526_v27 = vld [vmem:[#allocation7 + $0x1d8] sm:$0xf0]  ;;  %v3399_v44 = vld [vmem:[#allocation7 + $0x2ac] sm:$0xf] }
  0xcf   :  { %2035 = vmatpush.bf16.msra.mxu0 %v2877_v48  ;;  %v2957_v46 = vor.u32 %v3481_v39, %v2956_v38  ;;  %v2940_v48 = vld [vmem:[#allocation7 + $0x508] sm:$0xf]  ;;  %v2654_v30 = vld [vmem:[#allocation7 + $0x2d8] sm:$0xf0]  ;;  %v3335_v38 = vld [vmem:[#allocation7 + $0xac] sm:$0xf] }
  0xd0   :  { %2049 = vmatpush.bf16.msra.mxu1 %v3005_v49  ;;  %v3477_v49 = vld [vmem:[#allocation7 + $0x514] sm:$0xf0]  ;;  %v1791_v53 = vpop.f32.mrf.mxu2  ;;  %v2382_v39 = vld [vmem:[#allocation7 + $0xb8] sm:$0xf0]  ;;  %v3395_v56 = vld [vmem:[#allocation7 + $0x28c] sm:$0xf] }
  0xd1   :  { %2063 = vmatpush.bf16.msra.mxu2 %v3133_v54  ;;  %v3068_v54 = vld [vmem:[#allocation7 + $0x608] sm:$0xf]  ;;  %v1792_v60 = vadd.f32 %v1791_v53, %v1778_v41  ;;  %v2785_v41 = vor.u32 %v3435_v32, %v2782_v34  ;;  %v2638_v45 = vld [vmem:[#allocation7 + $0x2b8] sm:$0xf0]  ;;  %v2385_v47 = vor.u32 %v3335_v38, %v2382_v39  ;;  %v3359_v13 = vld [vmem:[#allocation7 + $0x16c] sm:$0xf] }
  0xd2   :  { %2077 = vmatpush.bf16.msra.mxu3 %v3261_v55  ;;  %v3509_v55 = vld [vmem:[#allocation7 + $0x614] sm:$0xf0]  ;;  %v2750_v0 = vld [vmem:[#allocation7 + $0x398] sm:$0xf0]  ;;  %v3355_v32 = vld [vmem:[#allocation7 + $0x14c] sm:$0xf] }
  0xd3   :  { %2036 = vmatpush.bf16.msra.mxu0 %v2861_v4  ;;  %v2542_v4 = vld [vmem:[#allocation7 + $0x1f8] sm:$0xf0]  ;;  %v3841_v5 = vadd.f32 %v1805_v61, %v1792_v60  ;;  %v3069_v16 = vor.u32 %v3509_v55, %v3068_v54  ;;  %v3363_v54 = vld [vmem:[#allocation7 + $0x18c] sm:$0xf] }
  0xd4   :  { %2050 = vmatpush.bf16.msra.mxu1 %v2989_v26  ;;  %v3407_v26 = vld [vmem:[#allocation7 + $0x2ec] sm:$0xf]  ;;  %v2545_v20 = vor.u32 %v3375_v3, %v2542_v4  ;;  %v2494_v55 = vld [vmem:[#allocation7 + $0x198] sm:$0xf0] }
  0xd5   :  { %2064 = vmatpush.bf16.msra.mxu2 %v3117_v8  ;;  %v2941_v8 = vor.u32 %v3477_v49, %v2940_v48  ;;  %v2513_v48 = vor.u32 %v3367_v42, %v2510_v43  ;;  %v3331_v49 = vld [vmem:[#allocation7 + $0x8c] sm:$0xf]  ;;  %v2622_v60 = vld [vmem:[#allocation7 + $0x298] sm:$0xf0]  ;;  %v2497_v4 = vor.u32 %v3363_v54, %v2494_v55 }
  0xd6   :  { %2078 = vmatpush.bf16.msra.mxu3 %v3245_v11  ;;  %v2670_v11 = vld [vmem:[#allocation7 + $0x2f8] sm:$0xf0]  ;;  %v3427_v61 = vld [vmem:[#allocation7 + $0x38c] sm:$0xf] }
  0xd7   :  { %2037 = vmatpush.bf16.msra.mxu0 %v2845_v25  ;;  %v2673_v23 = vor.u32 %v3407_v26, %v2670_v11  ;;  %v3371_v25 = vld [vmem:[#allocation7 + $0x1cc] sm:$0xf]  ;;  %v2625_v11 = vor.u32 %v3395_v56, %v2622_v60  ;;  %v2753_v12 = vor.u32 %v3427_v61, %v2750_v0  ;;  %v2462_v34 = vld [vmem:[#allocation7 + $0x158] sm:$0xf0] }
  0xd8   :  { %2051 = vmatpush.bf16.msra.mxu1 %v2973_v29  ;;  %v3403_v29 = vld [vmem:[#allocation7 + $0x2cc] sm:$0xf]  ;;  %v2590_v39 = vld [vmem:[#allocation7 + $0x258] sm:$0xf0] }
  0xd9   :  { %2065 = vmatpush.bf16.msra.mxu2 %v3101_v36  ;;  %v2401_v36 = vor.u32 %v3339_v21, %v2398_v22  ;;  %v2657_v40 = vor.u32 %v3403_v29, %v2654_v30  ;;  %v3423_v21 = vld [vmem:[#allocation7 + $0x36c] sm:$0xf]  ;;  %v2734_v22 = vld [vmem:[#allocation7 + $0x378] sm:$0xf0] }
  0xda   :  { %2079 = vmatpush.bf16.msra.mxu3 %v3229_v37  ;;  %v2529_v37 = vor.u32 %v3371_v25, %v2526_v27  ;;  %v2334_v25 = vld [vmem:[#allocation7 + $0x58] sm:$0xf0]  ;;  %v2737_v29 = vor.u32 %v3423_v21, %v2734_v22  ;;  %v3383_v54 = vld [vmem:[#allocation7 + $0x22c] sm:$0xf] }
  0xdb   :  { %2038 = vmatpush.bf16.msra.mxu0 %v2829_v6  ;;  %v3431_v6 = vld [vmem:[#allocation7 + $0x3ac] sm:$0xf]  ;;  %v2574_v56 = vld [vmem:[#allocation7 + $0x238] sm:$0xf0] }
  0xdc   :  { %2052 = vmatpush.bf16.msra.mxu1 %v2957_v46  ;;  %v2766_v46 = vld [vmem:[#allocation7 + $0x3b8] sm:$0xf0]  ;;  %v3415_v60 = vld [vmem:[#allocation7 + $0x32c] sm:$0xf] }
  0xdd   :  { %2066 = vmatpush.bf16.msra.mxu2 %v3085_v50  ;;  %v2366_v50 = vld [vmem:[#allocation7 + $0x98] sm:$0xf0]  ;;  %v2769_v53 = vor.u32 %v3431_v6, %v2766_v46  ;;  %v2465_v6 = vor.u32 %v3355_v32, %v2462_v34  ;;  %v3315_v0 = vld [vmem:[#allocation7 + $0xc] sm:$0xf] }
  0xde   :  { %2080 = vmatpush.bf16.msra.mxu3 %v3213_v52  ;;  %v2641_v52 = vor.u32 %v3399_v44, %v2638_v45  ;;  %v2369_v3 = vor.u32 %v3331_v49, %v2366_v50  ;;  %v2702_v61 = vld [vmem:[#allocation7 + $0x338] sm:$0xf0]  ;;  %v3503_v22 = vld [vmem:[#allocation7 + $0x5ec] sm:$0xf] }
  0xdf   :  { %2039 = vmatpush.bf16.msra.mxu0 %v2813_v7  ;;  %v3327_v7 = vld [vmem:[#allocation7 + $0x6c] sm:$0xf]  ;;  %v2926_v21 = vld [vmem:[#allocation7 + $0x4f8] sm:$0xf0] }
  0xe0   :  { %2053 = vmatpush.bf16.msra.mxu1 %v2941_v8  ;;  %v1831_v26 = vpop.f32.mrf.mxu1  ;;  %v2350_v8 = vld [vmem:[#allocation7 + $0x78] sm:$0xf0] }
  0xe1   :  { %2067 = vmatpush.bf16.msra.mxu2 %v3069_v16  ;;  %v1817_v1 = vpop.f32.mrf.mxu0  ;;  %v2478_v16 = vld [vmem:[#allocation7 + $0x178] sm:$0xf0] }
  0xe2   :  { %2081 = vmatpush.bf16.msra.mxu3 %v3197_v18  ;;  %2040 = vmatmul.bf16.vlgmr.msra.gmra.mxu0 %v3797_v57  ;;  %v1818_v2 = vadd.f32 %v1817_v1, %v3839_v28  ;;  %v3391_v18 = vld [vmem:[#allocation7 + $0x26c] sm:$0xf]  ;;  %v2481_v28 = vor.u32 %v3359_v13, %v2478_v16  ;;  %v3310_v32 = vld [vmem:[#allocation7 + $0x7f8] sm:$0xf0] }
  0xe3   :  { %2088 = vmatpush.bf16.msrb.mxu0 %v2417_v19  ;;  %2054 = vmatmul.bf16.vlgmr.msra.gmra.mxu1 %v3801_v62  ;;  %v3411_v13 = vld [vmem:[#allocation7 + $0x30c] sm:$0xf] }
  0xe4   :  { %2102 = vmatpush.bf16.msrb.mxu1 %v2545_v20  ;;  %2068 = vmatmul.bf16.vlgmr.msra.gmra.mxu2 %v3799_v58  ;;  %v1832_v19 = vadd.f32 %v1831_v26, %v1818_v2  ;;  %v2606_v20 = vld [vmem:[#allocation7 + $0x278] sm:$0xf0]  ;;  %v2577_v26 = vor.u32 %v3383_v54, %v2574_v56  ;;  %v3495_v56 = vld [vmem:[#allocation7 + $0x5ac] sm:$0xf] }
  0xe5   :  { %2116 = vmatpush.bf16.msrb.mxu2 %v2673_v23  ;;  %2082 = vmatmul.bf16.vlgmr.msra.gmra.mxu3 %v3803_v63  ;;  %v2353_v23 = vor.u32 %v3327_v7, %v2350_v8  ;;  %v2609_v27 = vor.u32 %v3391_v18, %v2606_v20  ;;  %v2302_v2 = vld [vmem:[#allocation7 + $0x18] sm:$0xf0]  ;;  %v2705_v7 = vor.u32 %v3415_v60, %v2702_v61  ;;  %v3471_v20 = vld [vmem:[#allocation7 + $0x4ec] sm:$0xf] }
  0xe6   :  { %2130 = vmatpush.bf16.msrb.mxu3 %v2801_v24  ;;  %v3323_v24 = vld [vmem:[#allocation7 + $0x4c] sm:$0xf]  ;;  %v3022_v60 = vld [vmem:[#allocation7 + $0x5b8] sm:$0xf0] }
  0xe7   :  { %2089 = vmatpush.bf16.msrb.mxu0 %v2401_v36  ;;  %v3387_v36 = vld [vmem:[#allocation7 + $0x24c] sm:$0xf]  ;;  %v2337_v43 = vor.u32 %v3323_v24, %v2334_v25  ;;  %v2305_v25 = vor.u32 %v3315_v0, %v2302_v2  ;;  %v3150_v0 = vld [vmem:[#allocation7 + $0x6b8] sm:$0xf0] }
  0xe8   :  { %2103 = vmatpush.bf16.msrb.mxu1 %v2529_v37  ;;  %v1859_v38 = vpop.f32.mrf.mxu3  ;;  %v1833_v46 = vpop.f32.mrf.mxu1  ;;  %v2593_v49 = vor.u32 %v3387_v36, %v2590_v39  ;;  %v3467_v39 = vld [vmem:[#allocation7 + $0x4cc] sm:$0xf] }
  0xe9   :  { %2117 = vmatpush.bf16.msrb.mxu2 %v2657_v40  ;;  %v1845_v30 = vpop.f32.mrf.mxu2  ;;  %v3419_v40 = vld [vmem:[#allocation7 + $0x34c] sm:$0xf]  ;;  %v1819_v42 = vpop.f32.mrf.mxu0 }
  0xea   :  { %2131 = vmatpush.bf16.msrb.mxu3 %v2785_v41  ;;  %v1846_v37 = vadd.f32 %v1845_v30, %v1832_v19  ;;  %v2718_v41 = vld [vmem:[#allocation7 + $0x358] sm:$0xf0]  ;;  %v1820_v44 = vadd.f32 %v1819_v42, %v3841_v5  ;;  %v3567_v30 = vld [vmem:[#allocation7 + $0x7ec] sm:$0xf] }
  0xeb   :  { %2090 = vmatpush.bf16.msrb.mxu0 %v2385_v47  ;;  %v3319_v47 = vld [vmem:[#allocation7 + $0x2c] sm:$0xf]  ;;  %v2721_v50 = vor.u32 %v3419_v40, %v2718_v41  ;;  %v2686_v19 = vld [vmem:[#allocation7 + $0x318] sm:$0xf0]  ;;  %v3313_v42 = vor.u32 %v3567_v30, %v3310_v32 }
  0xec   :  { %2104 = vmatpush.bf16.msrb.mxu1 %v2513_v48  ;;  %v3849_v45 = vadd.f32 %v1859_v38, %v1846_v37  ;;  %v2318_v48 = vld [vmem:[#allocation7 + $0x38] sm:$0xf0]  ;;  %v1834_v55 = vadd.f32 %v1833_v46, %v1820_v44  ;;  %v2689_v36 = vor.u32 %v3411_v13, %v2686_v19  ;;  %v2929_v37 = vor.u32 %v3471_v20, %v2926_v21  ;;  %v3527_v61 = vld [vmem:[#allocation7 + $0x6ac] sm:$0xf] }
  0xed   :  { %2118 = vmatpush.bf16.msrb.mxu2 %v2641_v52  ;;  %v3351_v52 = vld [vmem:[#allocation7 + $0x12c] sm:$0xf]  ;;  %v2321_v5 = vor.u32 %v3319_v47, %v2318_v48  ;;  %v2910_v40 = vld [vmem:[#allocation7 + $0x4d8] sm:$0xf0] }
  0xee   :  { %2132 = vmatpush.bf16.msrb.mxu3 %v2769_v53  ;;  %v2446_v53 = vld [vmem:[#allocation7 + $0x138] sm:$0xf0]  ;;  %v3563_v47 = vld [vmem:[#allocation7 + $0x7cc] sm:$0xf] }
  0xef   :  { %2091 = vmatpush.bf16.msrb.mxu0 %v2369_v3  ;;  %v2449_v1 = vor.u32 %v3351_v52, %v2446_v53  ;;  %v3347_v3 = vld [vmem:[#allocation7 + $0x10c] sm:$0xf]  ;;  %v3038_v44 = vld [vmem:[#allocation7 + $0x5d8] sm:$0xf0] }
  0xf0   :  { %2105 = vmatpush.bf16.msrb.mxu1 %v2497_v4  ;;  %v2430_v4 = vld [vmem:[#allocation7 + $0x118] sm:$0xf0]  ;;  %v1861_v18 = vpop.f32.mrf.mxu3  ;;  %v3463_v52 = vld [vmem:[#allocation7 + $0x4ac] sm:$0xf] }
  0xf1   :  { %2119 = vmatpush.bf16.msrb.mxu2 %v2625_v11  ;;  %v1847_v8 = vpop.f32.mrf.mxu2  ;;  %v3379_v11 = vld [vmem:[#allocation7 + $0x20c] sm:$0xf]  ;;  %v3166_v46 = vld [vmem:[#allocation7 + $0x6d8] sm:$0xf0] }
  0xf2   :  { %2133 = vmatpush.bf16.msrb.mxu3 %v2753_v12  ;;  %v2558_v12 = vld [vmem:[#allocation7 + $0x218] sm:$0xf0]  ;;  %v1848_v16 = vadd.f32 %v1847_v8, %v1834_v55  ;;  %v3555_v13 = vld [vmem:[#allocation7 + $0x78c] sm:$0xf] }
  0xf3   :  { %2092 = vmatpush.bf16.msrb.mxu0 %v2353_v23  ;;  %v3054_v23 = vld [vmem:[#allocation7 + $0x5f8] sm:$0xf0]  ;;  %v2561_v34 = vor.u32 %v3379_v11, %v2558_v12  ;;  %v3455_v21 = vld [vmem:[#allocation7 + $0x46c] sm:$0xf] }
  0xf4   :  { %2106 = vmatpush.bf16.msrb.mxu1 %v2481_v28  ;;  %v3535_v28 = vld [vmem:[#allocation7 + $0x6ec] sm:$0xf]  ;;  %v3851_v24 = vadd.f32 %v1861_v18, %v1848_v16  ;;  %v3057_v38 = vor.u32 %v3503_v22, %v3054_v23  ;;  %v3294_v48 = vld [vmem:[#allocation7 + $0x7d8] sm:$0xf0] }
  0xf5   :  { %2120 = vmatpush.bf16.msrb.mxu2 %v2609_v27  ;;  %v2433_v27 = vor.u32 %v3347_v3, %v2430_v4  ;;  %v2894_v53 = vld [vmem:[#allocation7 + $0x4b8] sm:$0xf0]  ;;  %v3297_v55 = vor.u32 %v3563_v47, %v3294_v48  ;;  %v3025_v3 = vor.u32 %v3495_v56, %v3022_v60  ;;  %v3459_v4 = vld [vmem:[#allocation7 + $0x48c] sm:$0xf] }
  0xf6   :  { %2134 = vmatpush.bf16.msrb.mxu3 %v2737_v29  ;;  %v3182_v29 = vld [vmem:[#allocation7 + $0x6f8] sm:$0xf0]  ;;  %v2897_v2 = vor.u32 %v3463_v52, %v2894_v53 }
  0xf7   :  { %2093 = vmatpush.bf16.msrb.mxu0 %v2337_v43  ;;  %v3185_v41 = vor.u32 %v3535_v28, %v3182_v29  ;;  %v3499_v43 = vld [vmem:[#allocation7 + $0x5cc] sm:$0xf]  ;;  %v3006_v11 = vld [vmem:[#allocation7 + $0x598] sm:$0xf0] }
  0xf8   :  { %2107 = vmatpush.bf16.msrb.mxu1 %v2465_v6  ;;  %v3531_v6 = vld [vmem:[#allocation7 + $0x6cc] sm:$0xf]  ;;  %v3134_v12 = vld [vmem:[#allocation7 + $0x698] sm:$0xf0] }
  0xf9   :  { %2121 = vmatpush.bf16.msrb.mxu2 %v2593_v49  ;;  %v2913_v49 = vor.u32 %v3467_v39, %v2910_v40  ;;  %v3169_v54 = vor.u32 %v3531_v6, %v3166_v46  ;;  %v3262_v16 = vld [vmem:[#allocation7 + $0x798] sm:$0xf0]  ;;  %v3519_v29 = vld [vmem:[#allocation7 + $0x66c] sm:$0xf] }
  0xfa   :  { %2135 = vmatpush.bf16.msrb.mxu3 %v2721_v50  ;;  %v3041_v50 = vor.u32 %v3499_v43, %v3038_v44  ;;  %v2862_v22 = vld [vmem:[#allocation7 + $0x478] sm:$0xf0]  ;;  %v3265_v28 = vor.u32 %v3555_v13, %v3262_v16  ;;  %v3483_v43 = vld [vmem:[#allocation7 + $0x54c] sm:$0xf] }
  0xfb   :  { %2094 = vmatpush.bf16.msrb.mxu0 %v2321_v5  ;;  %v3559_v5 = vld [vmem:[#allocation7 + $0x7ac] sm:$0xf]  ;;  %v3118_v32 = vld [vmem:[#allocation7 + $0x678] sm:$0xf0] }
  0xfc   :  { %2108 = vmatpush.bf16.msrb.mxu1 %v2449_v1  ;;  %v3278_v1 = vld [vmem:[#allocation7 + $0x7b8] sm:$0xf0]  ;;  %v3121_v40 = vor.u32 %v3519_v29, %v3118_v32  ;;  %v3515_v6 = vld [vmem:[#allocation7 + $0x64c] sm:$0xf] }
  0xfd   :  { %2122 = vmatpush.bf16.msrb.mxu2 %v2577_v26  ;;  %v2878_v26 = vld [vmem:[#allocation7 + $0x498] sm:$0xf0]  ;;  %v3281_v8 = vor.u32 %v3559_v5, %v3278_v1 }
  0xfe   :  { %2136 = vmatpush.bf16.msrb.mxu3 %v2705_v7  ;;  %v3153_v7 = vor.u32 %v3527_v61, %v3150_v0  ;;  %v2846_v39 = vld [vmem:[#allocation7 + $0x458] sm:$0xf0]  ;;  %v3447_v61 = vld [vmem:[#allocation7 + $0x42c] sm:$0xf] }
  0xff   :  { %2095 = vmatpush.bf16.msrb.mxu0 %v2305_v25  ;;  %v1873_v18 = vpop.f32.mrf.mxu0  ;;  %v3487_v25 = vld [vmem:[#allocation7 + $0x56c] sm:$0xf]  ;;  %v2974_v44 = vld [vmem:[#allocation7 + $0x558] sm:$0xf0] }
 0x100   :  { %2109 = vmatpush.bf16.msrb.mxu1 %v2433_v27  ;;  %v1887_v20 = vpop.f32.mrf.mxu1  ;;  %v2990_v27 = vld [vmem:[#allocation7 + $0x578] sm:$0xf0]  ;;  %v2977_v56 = vor.u32 %v3483_v43, %v2974_v44 }
 0x101   :  { %2123 = vmatpush.bf16.msrb.mxu2 %v2561_v34  ;;  %v3551_v34 = vld [vmem:[#allocation7 + $0x76c] sm:$0xf]  ;;  %v3102_v48 = vld [vmem:[#allocation7 + $0x658] sm:$0xf0] }
 0x102   :  { %2137 = vmatpush.bf16.msrb.mxu3 %v2689_v36  ;;  %2096 = vmatmul.bf16.vlgmr.msrb.gmra.mxu0 %v3785_v9  ;;  %v3491_v9 = vld [vmem:[#allocation7 + $0x58c] sm:$0xf]  ;;  %v3246_v36 = vld [vmem:[#allocation7 + $0x778] sm:$0xf0]  ;;  %v3105_v5 = vor.u32 %v3515_v6, %v3102_v48 }
 0x103   :  { %2144 = vmatpush.bf16.msra.mxu0 %v2929_v37  ;;  %2110 = vmatmul.bf16.vlgmr.msrb.gmra.mxu1 %v3789_v14  ;;  %v1874_v14 = vadd.f32 %v1873_v18, %v3819_v33  ;;  %v3009_v19 = vor.u32 %v3491_v9, %v3006_v11  ;;  %v2865_v37 = vor.u32 %v3455_v21, %v2862_v22  ;;  %v2830_v0 = vld [vmem:[#allocation7 + $0x438] sm:$0xf0] }
 0x104   :  { %2158 = vmatpush.bf16.msra.mxu1 %v3057_v38  ;;  %2124 = vmatmul.bf16.vlgmr.msrb.gmra.mxu2 %v3787_v10  ;;  %v3523_v10 = vld [vmem:[#allocation7 + $0x68c] sm:$0xf]  ;;  %v2993_v33 = vor.u32 %v3487_v25, %v2990_v27  ;;  %v3214_v9 = vld [vmem:[#allocation7 + $0x738] sm:$0xf0]  ;;  %v2833_v11 = vor.u32 %v3447_v61, %v2830_v0 }
 0x105   :  { %2172 = vmatpush.bf16.msra.mxu2 %v3185_v41  ;;  %2138 = vmatmul.bf16.vlgmr.msrb.gmra.mxu3 %v3791_v15  ;;  %v2881_v15 = vor.u32 %v3459_v4, %v2878_v26  ;;  %v3137_v23 = vor.u32 %v3523_v10, %v3134_v12  ;;  %v1888_v30 = vadd.f32 %v1887_v20, %v1874_v14  ;;  %v3451_v38 = vld [vmem:[#allocation7 + $0x44c] sm:$0xf]  ;;  %v2814_v12 = vld [vmem:[#allocation7 + $0x418] sm:$0xf0] }
 0x106   :  { %2186 = vmatpush.bf16.msra.mxu3 %v3313_v42  ;;  %v3249_v41 = vor.u32 %v3551_v34, %v3246_v36  ;;  %v2849_v53 = vor.u32 %v3451_v38, %v2846_v39  ;;  %v3511_v4 = vld [vmem:[#allocation7 + $0x62c] sm:$0xf]  ;;  %v3070_v22 = vld [vmem:[#allocation7 + $0x618] sm:$0xf0] }
 0x107   :  { %2145 = vmatpush.bf16.msra.mxu0 %v2913_v49  ;;  %v1901_v42 = vpop.f32.mrf.mxu2  ;;  %v3547_v49 = vld [vmem:[#allocation7 + $0x74c] sm:$0xf]  ;;  %v1875_v52 = vpop.f32.mrf.mxu0 }
 0x108   :  { %2159 = vmatpush.bf16.msra.mxu1 %v3041_v50  ;;  %v1902_v46 = vadd.f32 %v1901_v42, %v1888_v30  ;;  %v1915_v47 = vpop.f32.mrf.mxu3  ;;  %v3230_v50 = vld [vmem:[#allocation7 + $0x758] sm:$0xf0]  ;;  %v1889_v60 = vpop.f32.mrf.mxu1  ;;  %v3443_v10 = vld [vmem:[#allocation7 + $0x40c] sm:$0xf]  ;;  %v3871_v42 = vld [vmem:[#allocation10] sm:$0xf] }
 0x109   :  { %2173 = vmatpush.bf16.msra.mxu2 %v3169_v54  ;;  %v1876_v54 = vadd.f32 %v1875_v52, %v3827_v17  ;;  %v3233_v1 = vor.u32 %v3547_v49, %v3230_v50  ;;  %v3475_v14 = vld [vmem:[#allocation7 + $0x50c] sm:$0xf]  ;;  %v2817_v27 = vor.u32 %v3443_v10, %v2814_v12  ;;  %v2229_v49 = vperm.slane %v3871_v42, 1 }
 0x10a   :  { %2187 = vmatpush.bf16.msra.mxu3 %v3297_v55  ;;  %v1916_v55 = vadd.f32 %v1915_v47, %v1902_v46  ;;  %v3866_v34 = vld [vmem:[%s3900_s4] sm:$0xf]  ;;  %v2228_v47 = vperm.slane %v3871_v42, 0 }
 0x10b   :  { %2146 = vmatpush.bf16.msra.mxu0 %v2897_v2  ;;  %v3479_v2 = vld [vmem:[#allocation7 + $0x52c] sm:$0xf]  ;;  %v1890_v26 = vadd.f32 %v1889_v60, %v1876_v54  ;;  %v2202_v38 = vperm.slane %v3866_v34, 0 }
 0x10c   :  { %2160 = vmatpush.bf16.msra.mxu1 %v3025_v3  ;;  %v2958_v3 = vld [vmem:[#allocation7 + $0x538] sm:$0xf0] }
 0x10d   :  { %2174 = vmatpush.bf16.msra.mxu2 %v3153_v7  ;;  %v3086_v7 = vld [vmem:[#allocation7 + $0x638] sm:$0xf0]  ;;  %v2961_v17 = vor.u32 %v3479_v2, %v2958_v3  ;;  %v2214_v54 = vadd.f32 %v2202_v38, %v3851_v24 }
 0x10e   :  { %2188 = vmatpush.bf16.msra.mxu3 %v3281_v8  ;;  %v3543_v8 = vld [vmem:[#allocation7 + $0x72c] sm:$0xf]  ;;  %v3089_v13 = vor.u32 %v3511_v4, %v3086_v7 }
 0x10f   :  { %2147 = vmatpush.bf16.msra.mxu0 %v2881_v15  ;;  %v3217_v16 = vor.u32 %v3543_v8, %v3214_v9  ;;  %v1903_v18 = vpop.f32.mrf.mxu2  ;;  %v2942_v15 = vld [vmem:[#allocation7 + $0x518] sm:$0xf0] }
 0x110   :  { %2161 = vmatpush.bf16.msra.mxu1 %v3009_v19  ;;  %v3507_v19 = vld [vmem:[#allocation7 + $0x60c] sm:$0xf]  ;;  %v1904_v20 = vadd.f32 %v1903_v18, %v1890_v26  ;;  %v1917_v21 = vpop.f32.mrf.mxu3  ;;  %v2945_v29 = vor.u32 %v3475_v14, %v2942_v15 }
 0x111   :  { %2175 = vmatpush.bf16.msra.mxu2 %v3137_v23  ;;  %v3539_v23 = vld [vmem:[#allocation7 + $0x70c] sm:$0xf]  ;;  %v3073_v30 = vor.u32 %v3507_v19, %v3070_v22 }
 0x112   :  { %2189 = vmatpush.bf16.msra.mxu3 %v3265_v28  ;;  %v3198_v28 = vld [vmem:[#allocation7 + $0x718] sm:$0xf0]  ;;  %v1918_v25 = vadd.f32 %v1917_v21, %v1904_v20 }
 0x113   :  { %2148 = vmatpush.bf16.msra.mxu0 %v2865_v37  ;;  %v3201_v32 = vor.u32 %v3539_v23, %v3198_v28 }
 0x114   :  { %2162 = vmatpush.bf16.msra.mxu1 %v2993_v33 }
 0x115   :  { %2176 = vmatpush.bf16.msra.mxu2 %v3121_v40 }
 0x116   :  { %2190 = vmatpush.bf16.msra.mxu3 %v3249_v41 }
 0x117   :  { %2149 = vmatpush.bf16.msra.mxu0 %v2849_v53 }
 0x118   :  { %2163 = vmatpush.bf16.msra.mxu1 %v2977_v56 }
 0x119   :  { %2177 = vmatpush.bf16.msra.mxu2 %v3105_v5  ;;  %v2222_v5 = vmax.f32 %v2214_v54, 0.0 }
 0x11a   :  { %2191 = vmatpush.bf16.msra.mxu3 %v3233_v1 }
 0x11b   :  { %2150 = vmatpush.bf16.msra.mxu0 %v2833_v11  ;;  %v2240_v3 = vmul.f32 %v2228_v47, %v2222_v5 }
 0x11c   :  { %2164 = vmatpush.bf16.msra.mxu1 %v2961_v17 }
 0x11d   :  { %2178 = vmatpush.bf16.msra.mxu2 %v3089_v13 }
 0x11e   :  { %2192 = vmatpush.bf16.msra.mxu3 %v3217_v16 }
 0x11f   :  { %2151 = vmatpush.bf16.msra.mxu0 %v2817_v27  ;;  %v1929_v36 = vpop.f32.mrf.mxu0 }
 0x120   :  { %2165 = vmatpush.bf16.msra.mxu1 %v2945_v29  ;;  %v1930_v37 = vadd.f32 %v1929_v36, %v1916_v55  ;;  %v1943_v33 = vpop.f32.mrf.mxu1 }
 0x121   :  { %2179 = vmatpush.bf16.msra.mxu2 %v3073_v30 }
 0x122   :  { %2193 = vmatpush.bf16.msra.mxu3 %v3201_v32  ;;  %2152 = vmatmul.bf16.vlgmr.msra.gmra.mxu0 %v3797_v57  ;;  %v1944_v39 = vadd.f32 %v1943_v33, %v1930_v37  ;;  %v2210_v57 = vadd.f32 %v2202_v38, %v3849_v45 }
 0x123   :  { %2166 = vmatmul.bf16.vlgmr.msra.gmra.mxu1 %v3801_v62 }
 0x124   :  { %2180 = vmatmul.bf16.vlgmr.msra.gmra.mxu2 %v3799_v58  ;;  %v2203_v58 = vperm.slane %v3866_v34, 1  ;;  %v2218_v46 = vmax.f32 %v2210_v57, 0.0 }
 0x125   :  { %2194 = vmatmul.bf16.vlgmr.msra.gmra.mxu3 %v3803_v63 }
 0x126   :  { %v2236_v45 = vmul.f32 %v2228_v47, %v2218_v46 }
 0x127   :  { %v1957_v40 = vpop.f32.mrf.mxu2  ;;  %v1931_v63 = vpop.f32.mrf.mxu0 }
 0x128   :  { %v1958_v41 = vadd.f32 %v1957_v40, %v1944_v39  ;;  %v1971_v62 = vpop.f32.mrf.mxu3  ;;  %v1932_v43 = vadd.f32 %v1931_v63, %v1918_v25  ;;  %v1945_v6 = vpop.f32.mrf.mxu1 }
 0x12a   :  { %v1972_v44 = vadd.f32 %v1971_v62, %v1958_v41  ;;  %v1946_v52 = vadd.f32 %v1945_v6, %v1932_v43 }
 0x12c   :  { %v2211_v48 = vadd.f32 %v2203_v58, %v1972_v44 }
 0x12e   :  { %v2219_v50 = vmax.f32 %v2211_v48, 0.0 }
 0x12f   :  { %v1959_v53 = vpop.f32.mrf.mxu2 }
 0x130   :  { %v2237_v55 = vmul.f32 %v2229_v49, %v2219_v50  ;;  %v1960_v56 = vadd.f32 %v1959_v53, %v1946_v52  ;;  %v1973_v60 = vpop.f32.mrf.mxu3 }
 0x132   :  { %v1974_v61 = vadd.f32 %v1973_v60, %v1960_v56  ;;  %v3876_v0 = vadd.f32 %v2237_v55, %v2236_v45 }
 0x134   :  { %v2215_v1 = vadd.f32 %v2203_v58, %v1974_v61  ;;  %v2230_v61 = vperm.slane %v3871_v42, 2 }
 0x136   :  { %v2223_v2 = vmax.f32 %v2215_v1, 0.0 }
 0x138   :  { %v2241_v4 = vmul.f32 %v2229_v49, %v2223_v2 }
 0x13a   :  { %v3878_v26 = vadd.f32 %v2241_v4, %v2240_v3  ;;  %v2205_v4 = vperm.slane %v3866_v34, 3 }
 0x13f   :  { %v1985_v7 = vpop.f32.mrf.mxu0 }
 0x140   :  { %v1999_v8 = vpop.f32.mrf.mxu1  ;;  %v1986_v19 = vadd.f32 %v1985_v7, %v3821_v51 }
 0x142   :  { %v2000_v21 = vadd.f32 %v1999_v8, %v1986_v19 }
 0x147   :  { %v2013_v9 = vpop.f32.mrf.mxu2  ;;  %v1987_v17 = vpop.f32.mrf.mxu0 }
 0x148   :  { %v2027_v11 = vpop.f32.mrf.mxu3  ;;  %v2001_v10 = vpop.f32.mrf.mxu1  ;;  %v2014_v25 = vadd.f32 %v2013_v9, %v2000_v21  ;;  %v1988_v29 = vadd.f32 %v1987_v17, %v3833_v31  ;;  %v2204_v31 = vperm.slane %v3866_v34, 2 }
 0x14a   :  { %v2028_v30 = vadd.f32 %v2027_v11, %v2014_v25  ;;  %v2002_v33 = vadd.f32 %v2001_v10, %v1988_v29  ;;  %v2231_v10 = vperm.slane %v3871_v42, 3 }
 0x14f   :  { %v2015_v24 = vpop.f32.mrf.mxu2 }
 0x150   :  { %v2029_v12 = vpop.f32.mrf.mxu3  ;;  %v2016_v39 = vadd.f32 %v2015_v24, %v2002_v33 }
 0x152   :  { %v2030_v58 = vadd.f32 %v2029_v12, %v2016_v39 }
 0x15f   :  { %v2041_v13 = vpop.f32.mrf.mxu0 }
 0x160   :  { %v2055_v16 = vpop.f32.mrf.mxu1  ;;  %v2042_v32 = vadd.f32 %v2041_v13, %v2028_v30  ;;  %v3585_v30 = vld [vmem:[#allocation2] ss:$0 sm:$0xff] }
 0x162   :  { %v2056_v57 = vadd.f32 %v2055_v16, %v2042_v32 }
 0x167   :  { %v2069_v18 = vpop.f32.mrf.mxu2  ;;  %v2043_v15 = vpop.f32.mrf.mxu0 }
 0x168   :  { %v2083_v14 = vpop.f32.mrf.mxu3  ;;  %v2057_v20 = vpop.f32.mrf.mxu1  ;;  %v2070_v41 = vadd.f32 %v2069_v18, %v2056_v57  ;;  %v2044_v43 = vadd.f32 %v2043_v15, %v2030_v58 }
 0x16a   :  { %v2084_v6 = vadd.f32 %v2083_v14, %v2070_v41  ;;  %v2058_v50 = vadd.f32 %v2057_v20, %v2044_v43 }
 0x16c   :  { %v2212_v53 = vadd.f32 %v2204_v31, %v2084_v6 }
 0x16e   :  { %v2220_v60 = vmax.f32 %v2212_v53, 0.0 }
 0x16f   :  { %v2071_v22 = vpop.f32.mrf.mxu2 }
 0x170   :  { %v2085_v23 = vpop.f32.mrf.mxu3  ;;  %v2072_v54 = vadd.f32 %v2071_v22, %v2058_v50  ;;  %v2238_v24 = vmul.f32 %v2230_v61, %v2220_v60 }
 0x172   :  { %v2086_v1 = vadd.f32 %v2085_v23, %v2072_v54  ;;  %v2245_v20 = vadd.f32 %v3876_v0, %v2238_v24 }
 0x174   :  { %v2216_v11 = vadd.f32 %v2204_v31, %v2086_v1 }
 0x176   :  { %v2224_v14 = vmax.f32 %v2216_v11, 0.0 }
 0x178   :  { %v2242_v23 = vmul.f32 %v2230_v61, %v2224_v14 }
 0x17a   :  { %v2250_v42 = vadd.f32 %v3878_v26, %v2242_v23 }
 0x17f   :  { %v2097_v28 = vpop.f32.mrf.mxu0 }
 0x180   :  { %v2111_v27 = vpop.f32.mrf.mxu1  ;;  %v2098_v38 = vadd.f32 %v2097_v28, %v3823_v59 }
 0x182   :  { %v2112_v51 = vadd.f32 %v2111_v27, %v2098_v38 }
 0x187   :  { %v2125_v36 = vpop.f32.mrf.mxu2  ;;  %v2099_v40 = vpop.f32.mrf.mxu0 }
 0x188   :  { %v2139_v37 = vpop.f32.mrf.mxu3  ;;  %v2113_v62 = vpop.f32.mrf.mxu1  ;;  %v2126_v63 = vadd.f32 %v2125_v36, %v2112_v51  ;;  %v2100_v44 = vadd.f32 %v2099_v40, %v3835_v35 }
 0x18a   :  { %v2140_v48 = vadd.f32 %v2139_v37, %v2126_v63  ;;  %v2114_v59 = vadd.f32 %v2113_v62, %v2100_v44 }
 0x18f   :  { %v2127_v46 = vpop.f32.mrf.mxu2 }
 0x190   :  { %v2141_v47 = vpop.f32.mrf.mxu3  ;;  %v2128_v55 = vadd.f32 %v2127_v46, %v2114_v59 }
 0x192   :  { %v2142_v2 = vadd.f32 %v2141_v47, %v2128_v55 }
 0x19f   :  { %v2153_v49 = vpop.f32.mrf.mxu0 }
 0x1a0   :  { %v2154_v52 = vadd.f32 %v2153_v49, %v2140_v48  ;;  %v2167_v45 = vpop.f32.mrf.mxu1 }
 0x1a2   :  { %v2168_v56 = vadd.f32 %v2167_v45, %v2154_v52 }
 0x1a7   :  { %v2181_v5 = vpop.f32.mrf.mxu2  ;;  %v2155_v7 = vpop.f32.mrf.mxu0 }
 0x1a8   :  { %v2195_v35 = vpop.f32.mrf.mxu3  ;;  %v2182_v3 = vadd.f32 %v2181_v5, %v2168_v56  ;;  %v2156_v9 = vadd.f32 %v2155_v7, %v2142_v2  ;;  %v2169_v12 = vpop.f32.mrf.mxu1 }
 0x1aa   :  { %v2196_v8 = vadd.f32 %v2195_v35, %v2182_v3  ;;  %v2170_v16 = vadd.f32 %v2169_v12, %v2156_v9 }
 0x1ac   :  { %v2213_v17 = vadd.f32 %v2205_v4, %v2196_v8 }
 0x1ae   :  { %v2221_v13 = vmax.f32 %v2213_v17, 0.0 }
 0x1af   :  { %v2183_v18 = vpop.f32.mrf.mxu2 }
 0x1b0   :  { %v2184_v15 = vadd.f32 %v2183_v18, %v2170_v16  ;;  %v2239_v19 = vmul.f32 %v2231_v10, %v2221_v13  ;;  %v2197_v21 = vpop.f32.mrf.mxu3 }
 0x1b2   :  { %v2198_v22 = vadd.f32 %v2197_v21, %v2184_v15  ;;  %v2246_v34 = vadd.f32 %v2245_v20, %v2239_v19 }
 0x1b4   :  { %v2217_v28 = vadd.f32 %v2205_v4, %v2198_v22  ;;  %2247 = vadd.xlane.f32.xlu0 %v2246_v34 }
 0x1b6   :  { %v2225_v25 = vmax.f32 %v2217_v28, 0.0 }
 0x1b8   :  { %v2243_v27 = vmul.f32 %v2231_v10, %v2225_v25 }
 0x1ba   :  { %v2251_v29 = vadd.f32 %v2250_v42, %v2243_v27 }
 0x1bc   :  { %2252 = vadd.xlane.f32.xlu0 %v2251_v29 }
 0x227   :  { %v2248_v32 = vpop.xlane.xlu0 %2247 }
 0x228   :  { %v2258_v36 = vadd.f32 %v3585_v30, %v2248_v32 }
 0x22a   :  { %2261 = vst.msk [vmem:[%s3903_s7] sm:$0xff] %vm2260_vm1, %v2258_v36 }
 0x22f   :  { %v2253_v0 = vpop.xlane.xlu0 %2252 }
 0x230   :  { %v2259_v37 = vadd.f32 %v3585_v30, %v2253_v0 }
 0x232   :  { %2262 = vst.msk [vmem:[%s3903_s7 + $0x8] sm:$0xff] %vm2260_vm1, %v2259_v37 }
 0x233   :  { %2267 = vsyncpa [#allocation4], 1 }
 0x234   :  { %2268 = vsyncpa [#allocation6], 1 }
 0x235   :  { %2269 = vsyncpa [#allocation9], 1 }

</bundles_post_ra>
